<compile_context>
chip_gen: v5e
topology: v5e:2x2
jax: 0.10.0
libtpu: 0.0.40
codegen_flags: <defaults>
</compile_context>

<pallas_src>
import functools

import jax
import jax.numpy as jnp
from jax.experimental import pallas as pl
from jax.experimental.pallas import tpu as pltpu

_LANE = 128         # lane width -> Cout padding granularity (matmul operand only)
_TARGET_ROWS = 256  # max output rows per grid step -> f32 acc <= 256*128*4 = 128 KB


# ----------------------------- Pallas kernel ------------------------------ #
def _conv_bn_relu_kernel(x_ref, w_ref, sb_ref, o_ref, *,
                         kernel, stride, th, wo_pad, cout):
    """One (image, Ho-tile) step: k*k shifted-window matmuls + BN + ReLU.

    x_ref:  (1, Hp, Wp, Cin)     bf16 padded image (resident across Ho tiles)
    w_ref:  (k*k, Cin, Coutp)    bf16 conv weights, Cout lane-padded to 128
    sb_ref: (2, Cout)            f32 [scale; bias] from folded BatchNorm
    o_ref:  (1, th, Wo_pad, Cout) f32 output tile (unpadded channels)
    """
    i = pl.program_id(1)
    cin = x_ref.shape[3]
    coutp = w_ref.shape[2]
    rows = th * wo_pad

    h_win = (th - 1) * stride + kernel              # input rows needed by this tile
    row0 = pl.multiple_of(i * (th * stride), th * stride)
    xwin = x_ref[0, pl.ds(row0, h_win), :, :]       # (h_win, Wp, Cin) bf16

    # Per-tap accumulation.  Accumulator is (rows <= 256, 128) f32 <= 128 KB,
    # so it stays in vregs across the statically unrolled k*k loop.
    acc = jnp.zeros((rows, coutp), jnp.float32)
    for kh in range(kernel):
        for kw in range(kernel):
            patch = xwin[kh: kh + th * stride: stride,
                         kw: kw + wo_pad * stride: stride, :]    # (th, Wo_pad, Cin)
            # Wo_pad % 8 == 0 -> this reshape only re-groups sublane tiles.
            acc += jnp.dot(patch.reshape(rows, cin),
                           w_ref[kh * kernel + kw],
                           preferred_element_type=jnp.float32)

    # f32 epilogue on the real channels only: BN scale + bias, then ReLU.
    sb = sb_ref[...]                                 # (2, Cout) f32
    y = acc[:, :cout] * sb[0:1, :] + sb[1:2, :]
    y = jnp.maximum(y, 0.0)
    o_ref[0] = y.reshape(th, wo_pad, cout).astype(o_ref.dtype)


def _pick_tile_h(ho, wo_pad, target_rows=_TARGET_ROWS):
    """Ho-tile height: as large as possible with th*Wo_pad <= target_rows."""
    return max(1, min(ho, target_rows // max(wo_pad, 1)))


def _vmem_limit_bytes():
    """Per-generation VMEM budget (3/4 of physical, capped at 100 MiB)."""
    try:
        cap = pltpu.get_tpu_info().vmem_capacity_bytes
    except Exception:
        cap = 64 * 1024 * 1024        # conservative fallback (v7x-class)
    return int(min(cap * 3 // 4, 100 * 1024 * 1024))


# ------------------------------- wrapper ----------------------------------- #
@functools.partial(jax.jit, static_argnames=("kernel", "stride"))
def conv_bn_forward(x_nchw, weight, gamma, beta, run_mean, run_var,
                    *, kernel, stride, eps=1e-5):
    """Conv2d(bias=False, padding=(k-1)//2) + BatchNorm2d(eval) + ReLU."""
    n, cin, h, w = x_nchw.shape
    cout = weight.shape[0]
    pad = (kernel - 1) // 2
    ho = (h + 2 * pad - kernel) // stride + 1
    wo = (w + 2 * pad - kernel) // stride + 1

    # Wo padded to a sublane multiple; Ho padded to a whole number of tiles.
    wo_pad = ((wo + 7) // 8) * 8
    th = _pick_tile_h(ho, wo_pad)
    n_tiles = pl.cdiv(ho, th)
    ho_pad = n_tiles * th

    # Spatial input padding covers the (possibly padded) output extents so every
    # in-kernel window slice stays in-bounds; extra rows/cols are zeros and the
    # corresponding garbage outputs are sliced off below.
    hp_use = max(h + 2 * pad, (ho_pad - 1) * stride + kernel)
    wp_use = max(w + 2 * pad, (wo_pad - 1) * stride + kernel)
    xp = jnp.pad(x_nchw.transpose(0, 2, 3, 1),                   # NCHW -> NHWC
                 ((0, 0), (pad, hp_use - h - pad),
                  (pad, wp_use - w - pad), (0, 0))).astype(jnp.bfloat16)

    # Weights: (Cout, Cin, kh, kw) -> (k*k, Cin, Coutp), lane-padded for the MXU
    # operand only; BN scale is NOT folded in (applied in f32 epilogue instead).
    coutp = pl.cdiv(cout, _LANE) * _LANE
    w_kkio = weight.transpose(2, 3, 1, 0).reshape(kernel * kernel, cin, cout)
    w_pad = jnp.pad(w_kkio, ((0, 0), (0, 0), (0, coutp - cout))).astype(jnp.bfloat16)

    scale = gamma / jnp.sqrt(run_var + eps)                      # (Cout,)
    bias = beta - run_mean * scale
    sb = jnp.stack([scale, bias]).astype(jnp.float32)            # (2, Cout)

    grid = (n, n_tiles)
    flops = 2 * n * ho * wo * cin * kernel * kernel * cout       # true cout
    bytes_accessed = (xp.size * 2 + w_pad.size * 2 + sb.size * 4
                      + n * ho_pad * wo_pad * cout * 4)

    kern = functools.partial(_conv_bn_relu_kernel, kernel=kernel, stride=stride,
                             th=th, wo_pad=wo_pad, cout=cout)

    out = pl.pallas_call(
        kern,
        out_shape=jax.ShapeDtypeStruct((n, ho_pad, wo_pad, cout), jnp.float32),
        grid_spec=pltpu.PrefetchScalarGridSpec(
            num_scalar_prefetch=0,
            grid=grid,
            in_specs=[
                # Full padded image; index depends only on the batch axis so the
                # block stays resident in VMEM across the Ho-tile axis.
                pl.BlockSpec((1, hp_use, wp_use, cin), lambda b, i: (b, 0, 0, 0)),
                # Weights / BN params resident across the whole grid.
                pl.BlockSpec((kernel * kernel, cin, coutp),
                             lambda b, i: (0, 0, 0)),
                pl.BlockSpec((2, cout), lambda b, i: (0, 0)),
            ],
            out_specs=pl.BlockSpec((1, th, wo_pad, cout),
                                   lambda b, i: (b, i, 0, 0)),
        ),
        compiler_params=pltpu.CompilerParams(
            dimension_semantics=("parallel", "parallel"),
            vmem_limit_bytes=_vmem_limit_bytes(),
        ),
        cost_estimate=pl.CostEstimate(flops=flops, transcendentals=0,
                                      bytes_accessed=bytes_accessed),
    )(xp, w_pad, sb)

    out = out[:, :ho, :wo, :]              # strip Ho/Wo padding (channels unpadded)
    return out.transpose(0, 3, 1, 2)       # NHWC -> NCHW (PyTorch convention)


# ----------------------------- reference (JAX) ----------------------------- #
def conv_bn_reference(x_nchw, weight, gamma, beta, run_mean, run_var,
                      *, kernel, stride, eps=1e-5):
    pad = (kernel - 1) // 2
    y = jax.lax.conv_general_dilated(
        x_nchw, weight, window_strides=(stride, stride),
        padding=((pad, pad), (pad, pad)),
        dimension_numbers=("NCHW", "OIHW", "NCHW"))
    scale = gamma / jnp.sqrt(run_var + eps)
    bias = beta - run_mean * scale
    y = y * scale[None, :, None, None] + bias[None, :, None, None]
    return jnp.maximum(y, 0.0)


if __name__ == "__main__":
    # conv_bn(inp=4, oup=8, kernel=3, stride=1) on x: [2, 4, 16, 16]
    N, CIN, COUT, K, S, HW = 2, 4, 8, 3, 1, 16

    key = jax.random.PRNGKey(0)
    kx, kw_, kg, kb, km, kv = jax.random.split(key, 6)
    x = jax.random.normal(kx, (N, CIN, HW, HW), dtype=jnp.float32)
    weight = jax.random.normal(kw_, (COUT, CIN, K, K), dtype=jnp.float32) * 0.1
    gamma = jax.random.normal(kg, (COUT,), dtype=jnp.float32) * 0.1 + 1.0
    beta = jax.random.normal(kb, (COUT,), dtype=jnp.float32) * 0.1
    run_mean = jax.random.normal(km, (COUT,), dtype=jnp.float32) * 0.1
    run_var = jnp.abs(jax.random.normal(kv, (COUT,), dtype=jnp.float32)) * 0.1 + 0.5

    out = conv_bn_forward(x, weight, gamma, beta, run_mean, run_var,
                          kernel=K, stride=S)
    out = jax.block_until_ready(out)

    ref = conv_bn_reference(x, weight, gamma, beta, run_mean, run_var,
                            kernel=K, stride=S)
    assert out.shape == (N, COUT, HW, HW), out.shape
    # Deliberate precision tradeoff: bf16 matmul operands, f32 accumulation and
    # f32 BN/ReLU epilogue.
    assert jnp.allclose(out, ref, atol=5e-2, rtol=5e-2), \
        float(jnp.max(jnp.abs(out - ref)))

    print("KERNEL_OK")
</pallas_src>

<mosaic_0001>
module attributes {stable_mosaic.version = 11 : i64} {
  func.func @_conv_bn_relu_kernel(%arg0: i32, %arg1: i32, %arg2: memref<1x18x18x4xbf16, #tpu.memory_space<vmem>>, %arg3: memref<9x4x128xbf16, #tpu.memory_space<vmem>>, %arg4: memref<2x8xf32, #tpu.memory_space<vmem>>, %arg5: memref<1x16x16x8xf32, #tpu.memory_space<vmem>>) attributes {dimension_semantics = [#tpu.dimension_semantics<parallel>, #tpu.dimension_semantics<parallel>], iteration_bounds = array<i64: 2, 1>, scalar_prefetch = 0 : i64, scratch_operands = 0 : i64, tpu.core_type = #tpu.core_type<tc>, window_params = [{transform_indices = @transform_0, window_bounds = array<i64: 1, 18, 18, 4>}, {pipeline_mode = #tpu.pipeline_mode<synchronous>, transform_indices = @transform_1, window_bounds = array<i64: 9, 4, 128>}, {pipeline_mode = #tpu.pipeline_mode<synchronous>, transform_indices = @transform_2, window_bounds = array<i64: 2, 8>}, {transform_indices = @transform_3, window_bounds = array<i64: 1, 16, 16, 8>}]} {
    %c16_i32 = arith.constant 16 : i32
    %0 = arith.muli %arg1, %c16_i32 : i32
    %1 = tpu.assume_multiple %0, 16 : i32
    %c0 = arith.constant 0 : index
    %2 = arith.index_cast %1 : i32 to index
    %c0_0 = arith.constant 0 : index
    %c0_1 = arith.constant 0 : index
    %3 = vector.load %arg2[%c0, %2, %c0_0, %c0_1] : memref<1x18x18x4xbf16, #tpu.memory_space<vmem>>, vector<1x18x18x4xbf16>
    %4 = vector.shape_cast %3 : vector<1x18x18x4xbf16> to vector<18x18x4xbf16>
    %cst = arith.constant 0.000000e+00 : f32
    %5 = vector.broadcast %cst : f32 to vector<256x128xf32>
    %6 = vector.extract_strided_slice %4 {offsets = [0, 0, 0], sizes = [16, 16, 4], strides = [1, 1, 1]} : vector<18x18x4xbf16> to vector<16x16x4xbf16>
    %7 = vector.shape_cast %6 : vector<16x16x4xbf16> to vector<256x4xbf16>
    %c0_2 = arith.constant 0 : index
    %c0_3 = arith.constant 0 : index
    %c0_4 = arith.constant 0 : index
    %8 = vector.load %arg3[%c0_2, %c0_3, %c0_4] : memref<9x4x128xbf16, #tpu.memory_space<vmem>>, vector<1x4x128xbf16>
    %9 = vector.shape_cast %8 : vector<1x4x128xbf16> to vector<4x128xbf16>
    %cst_5 = arith.constant dense<0.000000e+00> : vector<256x128xf32>
    %10 = tpu.matmul %7, %9, %cst_5 {dimension_numbers = #tpu.dot_dimension_numbers<[1], [0], [0], [1], [0, 0, 1, 1], [], []>} : vector<256x4xbf16>, vector<4x128xbf16>, vector<256x128xf32> -> vector<256x128xf32>
    %11 = arith.addf %5, %10 : vector<256x128xf32>
    %12 = vector.extract_strided_slice %4 {offsets = [0, 1, 0], sizes = [16, 16, 4], strides = [1, 1, 1]} : vector<18x18x4xbf16> to vector<16x16x4xbf16>
    %13 = vector.shape_cast %12 : vector<16x16x4xbf16> to vector<256x4xbf16>
    %c1 = arith.constant 1 : index
    %c0_6 = arith.constant 0 : index
    %c0_7 = arith.constant 0 : index
    %14 = vector.load %arg3[%c1, %c0_6, %c0_7] : memref<9x4x128xbf16, #tpu.memory_space<vmem>>, vector<1x4x128xbf16>
    %15 = vector.shape_cast %14 : vector<1x4x128xbf16> to vector<4x128xbf16>
    %cst_8 = arith.constant dense<0.000000e+00> : vector<256x128xf32>
    %16 = tpu.matmul %13, %15, %cst_8 {dimension_numbers = #tpu.dot_dimension_numbers<[1], [0], [0], [1], [0, 0, 1, 1], [], []>} : vector<256x4xbf16>, vector<4x128xbf16>, vector<256x128xf32> -> vector<256x128xf32>
    %17 = arith.addf %11, %16 : vector<256x128xf32>
    %18 = vector.extract_strided_slice %4 {offsets = [0, 2, 0], sizes = [16, 16, 4], strides = [1, 1, 1]} : vector<18x18x4xbf16> to vector<16x16x4xbf16>
    %19 = vector.shape_cast %18 : vector<16x16x4xbf16> to vector<256x4xbf16>
    %c2 = arith.constant 2 : index
    %c0_9 = arith.constant 0 : index
    %c0_10 = arith.constant 0 : index
    %20 = vector.load %arg3[%c2, %c0_9, %c0_10] : memref<9x4x128xbf16, #tpu.memory_space<vmem>>, vector<1x4x128xbf16>
    %21 = vector.shape_cast %20 : vector<1x4x128xbf16> to vector<4x128xbf16>
    %cst_11 = arith.constant dense<0.000000e+00> : vector<256x128xf32>
    %22 = tpu.matmul %19, %21, %cst_11 {dimension_numbers = #tpu.dot_dimension_numbers<[1], [0], [0], [1], [0, 0, 1, 1], [], []>} : vector<256x4xbf16>, vector<4x128xbf16>, vector<256x128xf32> -> vector<256x128xf32>
    %23 = arith.addf %17, %22 : vector<256x128xf32>
    %24 = vector.extract_strided_slice %4 {offsets = [1, 0, 0], sizes = [16, 16, 4], strides = [1, 1, 1]} : vector<18x18x4xbf16> to vector<16x16x4xbf16>
    %25 = vector.shape_cast %24 : vector<16x16x4xbf16> to vector<256x4xbf16>
    %c3 = arith.constant 3 : index
    %c0_12 = arith.constant 0 : index
    %c0_13 = arith.constant 0 : index
    %26 = vector.load %arg3[%c3, %c0_12, %c0_13] : memref<9x4x128xbf16, #tpu.memory_space<vmem>>, vector<1x4x128xbf16>
    %27 = vector.shape_cast %26 : vector<1x4x128xbf16> to vector<4x128xbf16>
    %cst_14 = arith.constant dense<0.000000e+00> : vector<256x128xf32>
    %28 = tpu.matmul %25, %27, %cst_14 {dimension_numbers = #tpu.dot_dimension_numbers<[1], [0], [0], [1], [0, 0, 1, 1], [], []>} : vector<256x4xbf16>, vector<4x128xbf16>, vector<256x128xf32> -> vector<256x128xf32>
    %29 = arith.addf %23, %28 : vector<256x128xf32>
    %30 = vector.extract_strided_slice %4 {offsets = [1, 1, 0], sizes = [16, 16, 4], strides = [1, 1, 1]} : vector<18x18x4xbf16> to vector<16x16x4xbf16>
    %31 = vector.shape_cast %30 : vector<16x16x4xbf16> to vector<256x4xbf16>
    %c4 = arith.constant 4 : index
    %c0_15 = arith.constant 0 : index
    %c0_16 = arith.constant 0 : index
    %32 = vector.load %arg3[%c4, %c0_15, %c0_16] : memref<9x4x128xbf16, #tpu.memory_space<vmem>>, vector<1x4x128xbf16>
    %33 = vector.shape_cast %32 : vector<1x4x128xbf16> to vector<4x128xbf16>
    %cst_17 = arith.constant dense<0.000000e+00> : vector<256x128xf32>
    %34 = tpu.matmul %31, %33, %cst_17 {dimension_numbers = #tpu.dot_dimension_numbers<[1], [0], [0], [1], [0, 0, 1, 1], [], []>} : vector<256x4xbf16>, vector<4x128xbf16>, vector<256x128xf32> -> vector<256x128xf32>
    %35 = arith.addf %29, %34 : vector<256x128xf32>
    %36 = vector.extract_strided_slice %4 {offsets = [1, 2, 0], sizes = [16, 16, 4], strides = [1, 1, 1]} : vector<18x18x4xbf16> to vector<16x16x4xbf16>
    %37 = vector.shape_cast %36 : vector<16x16x4xbf16> to vector<256x4xbf16>
    %c5 = arith.constant 5 : index
    %c0_18 = arith.constant 0 : index
    %c0_19 = arith.constant 0 : index
    %38 = vector.load %arg3[%c5, %c0_18, %c0_19] : memref<9x4x128xbf16, #tpu.memory_space<vmem>>, vector<1x4x128xbf16>
    %39 = vector.shape_cast %38 : vector<1x4x128xbf16> to vector<4x128xbf16>
    %cst_20 = arith.constant dense<0.000000e+00> : vector<256x128xf32>
    %40 = tpu.matmul %37, %39, %cst_20 {dimension_numbers = #tpu.dot_dimension_numbers<[1], [0], [0], [1], [0, 0, 1, 1], [], []>} : vector<256x4xbf16>, vector<4x128xbf16>, vector<256x128xf32> -> vector<256x128xf32>
    %41 = arith.addf %35, %40 : vector<256x128xf32>
    %42 = vector.extract_strided_slice %4 {offsets = [2, 0, 0], sizes = [16, 16, 4], strides = [1, 1, 1]} : vector<18x18x4xbf16> to vector<16x16x4xbf16>
    %43 = vector.shape_cast %42 : vector<16x16x4xbf16> to vector<256x4xbf16>
    %c6 = arith.constant 6 : index
    %c0_21 = arith.constant 0 : index
    %c0_22 = arith.constant 0 : index
    %44 = vector.load %arg3[%c6, %c0_21, %c0_22] : memref<9x4x128xbf16, #tpu.memory_space<vmem>>, vector<1x4x128xbf16>
    %45 = vector.shape_cast %44 : vector<1x4x128xbf16> to vector<4x128xbf16>
    %cst_23 = arith.constant dense<0.000000e+00> : vector<256x128xf32>
    %46 = tpu.matmul %43, %45, %cst_23 {dimension_numbers = #tpu.dot_dimension_numbers<[1], [0], [0], [1], [0, 0, 1, 1], [], []>} : vector<256x4xbf16>, vector<4x128xbf16>, vector<256x128xf32> -> vector<256x128xf32>
    %47 = arith.addf %41, %46 : vector<256x128xf32>
    %48 = vector.extract_strided_slice %4 {offsets = [2, 1, 0], sizes = [16, 16, 4], strides = [1, 1, 1]} : vector<18x18x4xbf16> to vector<16x16x4xbf16>
    %49 = vector.shape_cast %48 : vector<16x16x4xbf16> to vector<256x4xbf16>
    %c7 = arith.constant 7 : index
    %c0_24 = arith.constant 0 : index
    %c0_25 = arith.constant 0 : index
    %50 = vector.load %arg3[%c7, %c0_24, %c0_25] : memref<9x4x128xbf16, #tpu.memory_space<vmem>>, vector<1x4x128xbf16>
    %51 = vector.shape_cast %50 : vector<1x4x128xbf16> to vector<4x128xbf16>
    %cst_26 = arith.constant dense<0.000000e+00> : vector<256x128xf32>
    %52 = tpu.matmul %49, %51, %cst_26 {dimension_numbers = #tpu.dot_dimension_numbers<[1], [0], [0], [1], [0, 0, 1, 1], [], []>} : vector<256x4xbf16>, vector<4x128xbf16>, vector<256x128xf32> -> vector<256x128xf32>
    %53 = arith.addf %47, %52 : vector<256x128xf32>
    %54 = vector.extract_strided_slice %4 {offsets = [2, 2, 0], sizes = [16, 16, 4], strides = [1, 1, 1]} : vector<18x18x4xbf16> to vector<16x16x4xbf16>
    %55 = vector.shape_cast %54 : vector<16x16x4xbf16> to vector<256x4xbf16>
    %c8 = arith.constant 8 : index
    %c0_27 = arith.constant 0 : index
    %c0_28 = arith.constant 0 : index
    %56 = vector.load %arg3[%c8, %c0_27, %c0_28] : memref<9x4x128xbf16, #tpu.memory_space<vmem>>, vector<1x4x128xbf16>
    %57 = vector.shape_cast %56 : vector<1x4x128xbf16> to vector<4x128xbf16>
    %cst_29 = arith.constant dense<0.000000e+00> : vector<256x128xf32>
    %58 = tpu.matmul %55, %57, %cst_29 {dimension_numbers = #tpu.dot_dimension_numbers<[1], [0], [0], [1], [0, 0, 1, 1], [], []>} : vector<256x4xbf16>, vector<4x128xbf16>, vector<256x128xf32> -> vector<256x128xf32>
    %59 = arith.addf %53, %58 : vector<256x128xf32>
    %c0_30 = arith.constant 0 : index
    %c0_31 = arith.constant 0 : index
    %60 = vector.load %arg4[%c0_30, %c0_31] : memref<2x8xf32, #tpu.memory_space<vmem>>, vector<2x8xf32>
    %61 = vector.extract_strided_slice %59 {offsets = [0, 0], sizes = [256, 8], strides = [1, 1]} : vector<256x128xf32> to vector<256x8xf32>
    %62 = vector.extract_strided_slice %60 {offsets = [0, 0], sizes = [1, 8], strides = [1, 1]} : vector<2x8xf32> to vector<1x8xf32>
    %63 = vector.broadcast %62 : vector<1x8xf32> to vector<256x8xf32>
    %64 = arith.mulf %61, %63 : vector<256x8xf32>
    %65 = vector.extract_strided_slice %60 {offsets = [1, 0], sizes = [1, 8], strides = [1, 1]} : vector<2x8xf32> to vector<1x8xf32>
    %66 = vector.broadcast %65 : vector<1x8xf32> to vector<256x8xf32>
    %67 = arith.addf %64, %66 : vector<256x8xf32>
    %cst_32 = arith.constant 0.000000e+00 : f32
    %68 = vector.broadcast %cst_32 : f32 to vector<256x8xf32>
    %69 = arith.maximumf %67, %68 : vector<256x8xf32>
    %70 = vector.shape_cast %69 : vector<256x8xf32> to vector<16x16x8xf32>
    %c0_33 = arith.constant 0 : index
    %c0_34 = arith.constant 0 : index
    %c0_35 = arith.constant 0 : index
    %c0_36 = arith.constant 0 : index
    %71 = vector.load %arg5[%c0_33, %c0_34, %c0_35, %c0_36] : memref<1x16x16x8xf32, #tpu.memory_space<vmem>>, vector<1x16x16x8xf32>
    %72 = vector.shape_cast %71 : vector<1x16x16x8xf32> to vector<16x16x8xf32>
    %73 = vector.shape_cast %70 : vector<16x16x8xf32> to vector<1x16x16x8xf32>
    tpu.vector_store %arg5[%c0_33, %c0_34, %c0_35, %c0_36], %73 {strides = array<i32>} : memref<1x16x16x8xf32, #tpu.memory_space<vmem>>, vector<1x16x16x8xf32>,
    return
  }
  func.func @transform_0(%arg0: i32, %arg1: i32) -> (i32, i32, i32, i32) {
    %c0_i32 = arith.constant 0 : i32
    %c0_i32_0 = arith.constant 0 : i32
    %c0_i32_1 = arith.constant 0 : i32
    %c0_i32_2 = arith.constant 0 : i32
    return %arg0, %c0_i32, %c0_i32_0, %c0_i32_1 : i32, i32, i32, i32
  }
  func.func @transform_1(%arg0: i32, %arg1: i32) -> (i32, i32, i32) {
    %c0_i32 = arith.constant 0 : i32
    %c0_i32_0 = arith.constant 0 : i32
    %c0_i32_1 = arith.constant 0 : i32
    %c0_i32_2 = arith.constant 0 : i32
    return %c0_i32, %c0_i32_0, %c0_i32_1 : i32, i32, i32
  }
  func.func @transform_2(%arg0: i32, %arg1: i32) -> (i32, i32) {
    %c0_i32 = arith.constant 0 : i32
    %c0_i32_0 = arith.constant 0 : i32
    %c0_i32_1 = arith.constant 0 : i32
    return %c0_i32, %c0_i32_0 : i32, i32
  }
  func.func @transform_3(%arg0: i32, %arg1: i32) -> (i32, i32, i32, i32) {
    %c0_i32 = arith.constant 0 : i32
    %c0_i32_0 = arith.constant 0 : i32
    %c0_i32_1 = arith.constant 0 : i32
    return %arg0, %arg1, %c0_i32, %c0_i32_0 : i32, i32, i32, i32
  }
}

</mosaic_0001>

<bundles_post_ra>
// kernel: conv_bn_forward.1
= control target key start
LH: loop header
LB: loop body
LE: loop exit
PB: predicated region body
PF: predicated region fallthrough
CT: control target
= control target key end

     0   :  { %s2840_s12 = smov 0   ;;  %s2842_s13 = smov 0   ;;  %s4059_s0 = inlined_call_operand.vmem [shape: bf16[2,18,18,4], index: 0, kind: input, shape index: {}]   ;;  %s4060_s1 = inlined_call_operand.vmem [shape: bf16[9,4,128], index: 1, kind: input, shape index: {}]   ;;  %s4061_s2 = inlined_call_operand.vmem [shape: f32[2,8], index: 2, kind: input, shape index: {}]   ;;  %s4062_s3 = inlined_call_operand.vmem [shape: f32[2,16,16,8], index: 3, kind: output, shape index: {}]  }
   0x1   :  { %s2844_s14 = smov 0  }
   0x2 LB: > { %s25_s15 = sadd.s32 1, %s2814_s13  ;;  %p2493_p0 = scmp.ge.s32.totalorder %s2818_s14, 1  ;;  %s2818_s14 = sphi %s2844_s14, %s13_s14   ;;  %s2814_s13 = sphi %s2842_s13, %s4202_s13   ;;  %s2810_s12 = sphi %s2840_s12, %s4201_s12  }
   0x3   : > { %p27_p1 = scmp.ge.s32.totalorder %s25_s15, 2  ;;  %p151_p2 = scmp.lt.s32.totalorder %s2818_s14, 3 }
   0x5   : > { %s4204_s15 = smov (%p27_p1, %s25_s15), 0  ;;  %p152_p3 = pnand %p2493_p0, %p151_p2 }
   0x7   : > { %155 = sbr.rel (%p152_p3) target bundleno = 761 (0x2f9), region = 32 }
   0xc   : > { %v2497_v0 = vld [vmem:[%s4060_s1 + $0x2] sm:$0x3]  ;;  %vm742_vm0 = vcmask 1041408   ;;  %p180_p4 = scmp.lt.s32.totalorder %s2810_s12, 1  ;;  %v2610_v2 = vld [vmem:[%s4060_s1 + $0x4] sm:$0x3] }
   0xd   : > { %v744_v1 = vsel %vm742_vm0, %v2497_v0, 0  ;;  %v1285_v3 = vsel %vm742_vm0, %v2610_v2, 0  ;;  %v2627_v4 = vld [vmem:[%s4060_s1 + $0x6] sm:$0x3]  ;;  %v255_v5 = vld [vmem:[%s4060_s1] sm:$0x3] }
   0xe   : > { %2760 = vmatpush.bf16.msra.mxu1 %v744_v1  ;;  %2761 = vmatpush.bf16.msra.mxu2 %v744_v1  ;;  %s4206_s12 = smov (!%p180_p4, %s2810_s12), 1  ;;  %v2648_v6 = vld [vmem:[%s4060_s1 + $0x8] sm:$0x3]  ;;  %v1419_v7 = vsel %vm742_vm0, %v2627_v4, 0  ;;  %v964_v8 = vsel %vm742_vm0, %v255_v5, 0  ;;  %vm693_vm4 = vcmask 31744  }
   0xf   : > { %2762 = vmatpush.bf16.msra.mxu3 %v744_v1  ;;  %753 = vmatpush.bf16.msra.mxu0 %v744_v1  ;;  %s2763_s26 = smul.u32 216, %s4206_s12  ;;  %v1575_v9 = vsel %vm742_vm0, %v2648_v6, 0  ;;  %vm256_vm1 = vsmask.f32 3328  ;;  %vm257_vm2 = vsmask.f32 7440 }
  0x10   : > { %vm2911_vm3 = vmor %vm256_vm1, %vm257_vm2  ;;  %vm1071_vm5 = vcmask 1042432   ;;  %vm1072_vm6 = vcmask 1046532   ;;  %s2741_s17 = sshll.u32 %s4206_s12, 8  ;;  %vm2367_vm8 = vcmask 64512  }
  0x11   : > { %s2884_s29 = scalar_lea.vmem %s4059_s0, %s2763_s26  ;;  %vm3214_vm7 = vmor %vm1071_vm5, %vm1072_vm6  ;;  %s3814_s20 = scalar_lea.vmem %s4062_s3, %s2741_s17 }
  0x12   : > { %1294 = vmatpush.bf16.msrb.mxu2 %v1285_v3  ;;  %973 = vmatpush.bf16.msrb.mxu1 %v964_v8  ;;  %v2887_v10 = vld [vmem:[%s2884_s29 + $0x30] sm:$0xf]  ;;  %v2890_v11 = vld [vmem:[%s2884_s29 + $0x34] sm:$0xf]  ;;  %v2893_v12 = vld [vmem:[%s2884_s29 + $0x38] sm:$0x1] }
  0x13   : > { %1428 = vmatpush.bf16.msrb.mxu3 %v1419_v7  ;;  %1584 = vmatpush.bf16.msrb.mxu0 %v1575_v9  ;;  %v356_v13 = vshrl.u32 %v2887_v10, 16  ;;  %v359_v14 = vshll.u32 %v2887_v10, 16  ;;  %v365_v15 = vshll.u32 %v2890_v11, 16  ;;  %v369_v16 = vshrl.u32 %v2890_v11, 16  ;;  %v225_v17 = vld [vmem:[%s2884_s29 + $0x60] sm:$0xf] }
  0x14   : > { %v375_v18 = vshll.u32 %v2893_v12, 16  ;;  %v2902_v19 = vld [vmem:[%s2884_s29 + $0x64] sm:$0xf]  ;;  %v227_v20 = vld [vmem:[%s2884_s29 + $0x68] sm:$0x1]  ;;  %v452_v21 = vshrl.u32 %v225_v17, 16 }
  0x15   : > { %v358_v22 = vrot.slane %v356_v13, 4  ;;  %v361_v23 = vrot.slane %v359_v14, 5  ;;  %v367_v24 = vrot.slane %v365_v15, 5  ;;  %v371_v25 = vrot.slane %v369_v16, 4  ;;  %v237_v26 = vld [vmem:[%s2884_s29 + $0x90] sm:$0xf] }
  0x16   : > { %v377_v27 = vrot.slane %v375_v18, 5  ;;  %v454_v28 = vrot.slane %v452_v21, 4  ;;  %v455_v29 = vshll.u32 %v225_v17, 16  ;;  %v461_v30 = vshll.u32 %v2902_v19, 16  ;;  %v238_v35 = vld [vmem:[%s2884_s29 + $0x94] sm:$0xf] }
  0x17   : > { %v362_v31 = vor.u32 %v361_v23, %v358_v22  ;;  %v372_v32 = vor.u32 %v371_v25, %v367_v24  ;;  %v465_v33 = vshrl.u32 %v2902_v19, 16  ;;  %v471_v34 = vshll.u32 %v227_v20, 16  ;;  %v239_v45 = vld [vmem:[%s2884_s29 + $0x98] sm:$0x1]  ;;  %v2921_v61 = vld [vmem:[%s2884_s29] sm:$0xf] }
  0x18   : > { %v457_v37 = vrot.slane %v455_v29, 5  ;;  %v463_v38 = vrot.slane %v461_v30, 5  ;;  %v548_v39 = vshrl.u32 %v237_v26, 16  ;;  %v551_v47 = vshll.u32 %v237_v26, 16  ;;  %v2928_v1 = vld [vmem:[%s2884_s29 + $0x4] sm:$0xf] }
  0x19   : > { %v363_v40 = vrot.slane %v362_v31, 4  ;;  %v373_v41 = vrot.slane %v372_v32, 4  ;;  %v467_v42 = vrot.slane %v465_v33, 4  ;;  %v473_v43 = vrot.slane %v471_v34, 5  ;;  %v2931_v2 = vld [vmem:[%s2884_s29 + $0x8] sm:$0x1] }
  0x1a   : > { %v458_v44 = vor.u32 %v457_v37, %v454_v28  ;;  %v550_v46 = vrot.slane %v548_v39, 4  ;;  %v557_v48 = vshll.u32 %v238_v35, 16  ;;  %v561_v52 = vshrl.u32 %v238_v35, 16  ;;  %v2947_v23 = vld [vmem:[%s2884_s29 + $0x3c] sm:$0xf] }
  0x1b   : > { %v368_v49 = vsel %vm2911_vm3, %v363_v40, %v367_v24  ;;  %v378_v50 = vsel %vm2911_vm3, %v373_v41, %v377_v27  ;;  %v468_v51 = vor.u32 %v467_v42, %v463_v38  ;;  %v553_v56 = vrot.slane %v551_v47, 5  ;;  %v2950_v24 = vld [vmem:[%s2884_s29 + $0x40] sm:$0xf]  ;;  %v2955_v29 = vld [vmem:[%s2884_s29 + $0x44] sm:$0x1] }
  0x1c   : > { %v653_v53 = vunpack.c.l.b16 %v368_v49  ;;  %v654_v54 = vunpack.c.l.b16 %v378_v50  ;;  %v459_v55 = vrot.slane %v458_v44, 4  ;;  %v559_v58 = vrot.slane %v557_v48, 5  ;;  %v2970_v47 = vld [vmem:[%s2884_s29 + $0x70] sm:$0xf] }
  0x1d   : > { %v469_v57 = vrot.slane %v468_v51, 4  ;;  %v563_v59 = vrot.slane %v561_v52, 4  ;;  %v567_v60 = vshll.u32 %v239_v45, 16  ;;  %v554_v0 = vor.u32 %v553_v56, %v550_v46  ;;  %v2977_v51 = vld [vmem:[%s2884_s29 + $0x74] sm:$0x1] }
  0x1e   : > { %v2923_v62 = vpack.c.b16 %v654_v54, %v653_v53  ;;  %v464_v63 = vsel %vm2911_vm3, %v459_v55, %v463_v38  ;;  %v260_v9 = vshrl.u32 %v2921_v61, 16  ;;  %v263_v13 = vshll.u32 %v2921_v61, 16  ;;  %v2963_v38 = vld [vmem:[%s2884_s29 + $0x6c] sm:$0xf] }
  0x1f   : > { %v474_v3 = vsel %vm2911_vm3, %v469_v57, %v473_v43  ;;  %v661_v4 = vunpack.c.l.b16 %v464_v63  ;;  %v564_v5 = vor.u32 %v563_v59, %v559_v58  ;;  %v569_v6 = vrot.slane %v567_v60, 5 }
  0x20   : > { %2502 = vmatmul.msk.bf16.vlgmr.msra.gmra.mxu1 %vm693_vm4, %v2923_v62  ;;  %v662_v7 = vunpack.c.l.b16 %v474_v3  ;;  %v555_v8 = vrot.slane %v554_v0, 4  ;;  %v269_v15 = vshll.u32 %v2928_v1, 16  ;;  %v273_v16 = vshrl.u32 %v2928_v1, 16 }
  0x21   : > { %v565_v14 = vrot.slane %v564_v5, 4  ;;  %v279_v17 = vshll.u32 %v2931_v2, 16  ;;  %v262_v21 = vrot.slane %v260_v9, 4  ;;  %v265_v22 = vrot.slane %v263_v13, 5  ;;  %v240_v5 = vld [vmem:[%s2884_s29 + $0x9c] sm:$0xf] }
  0x22   : > { %v2942_v18 = vpack.c.b16 %v662_v7, %v661_v4  ;;  %v560_v20 = vsel %vm2911_vm3, %v555_v8, %v559_v58  ;;  %v271_v27 = vrot.slane %v269_v15, 5  ;;  %v275_v28 = vrot.slane %v273_v16, 4  ;;  %v241_v9 = vld [vmem:[%s2884_s29 + $0xa0] sm:$0xf] }
  0x23   : > { %v570_v25 = vsel %vm2911_vm3, %v565_v14, %v569_v6  ;;  %v669_v26 = vunpack.c.l.b16 %v560_v20  ;;  %v266_v31 = vor.u32 %v265_v22, %v262_v21  ;;  %v281_v32 = vrot.slane %v279_v17, 5  ;;  %v242_v17 = vld [vmem:[%s2884_s29 + $0xa4] sm:$0x1] }
  0x24   : > { %4105 = vst [vmem:[#allocation2_spill] sm:$0xff] %v2942_v18  ;;  %2506 = vmatmul.msk.bf16.vlgmr.msra.gmra.mxu2 %vm693_vm4, %v2942_v18  ;;  %v670_v30 = vunpack.c.l.b16 %v570_v25  ;;  %v276_v33 = vor.u32 %v275_v28, %v271_v27  ;;  %v380_v34 = vshrl.u32 %v2947_v23, 16  ;;  %v383_v35 = vshll.u32 %v2947_v23, 16 }
  0x25   : > { %v389_v37 = vshll.u32 %v2950_v24, 16  ;;  %v267_v40 = vrot.slane %v266_v31, 4  ;;  %v393_v41 = vshrl.u32 %v2950_v24, 16  ;;  %v399_v42 = vshll.u32 %v2955_v29, 16 }
  0x26   : > { %v2965_v39 = vpack.c.b16 %v670_v30, %v669_v26  ;;  %v277_v43 = vrot.slane %v276_v33, 4  ;;  %v382_v44 = vrot.slane %v380_v34, 4  ;;  %v385_v45 = vrot.slane %v383_v35, 5  ;;  %v2995_v35 = vld [vmem:[%s2884_s29 + $0xc] sm:$0xf] }
  0x27   : > { %v391_v46 = vrot.slane %v389_v37, 5  ;;  %v272_v48 = vsel %vm2911_vm3, %v267_v40, %v271_v27  ;;  %v395_v49 = vrot.slane %v393_v41, 4  ;;  %v401_v50 = vrot.slane %v399_v42, 5 }
  0x28   : > { %4106 = vst [vmem:[#allocation3_spill] sm:$0xff] %v2965_v39  ;;  %2510 = vmatmul.msk.bf16.vlgmr.msra.gmra.mxu3 %vm693_vm4, %v2965_v39  ;;  %v476_v52 = vshrl.u32 %v2963_v38, 16  ;;  %v282_v53 = vsel %vm2911_vm3, %v277_v43, %v281_v32  ;;  %v645_v54 = vunpack.c.l.b16 %v272_v48  ;;  %v386_v55 = vor.u32 %v385_v45, %v382_v44  ;;  %v3002_v43 = vld [vmem:[%s2884_s29 + $0x10] sm:$0xf]  ;;  %v3005_v48 = vld [vmem:[%s2884_s29 + $0x14] sm:$0x1] }
  0x29   : > { %v479_v56 = vshll.u32 %v2963_v38, 16  ;;  %v646_v57 = vunpack.c.l.b16 %v282_v53  ;;  %v396_v58 = vor.u32 %v395_v49, %v391_v46  ;;  %v485_v60 = vshll.u32 %v2970_v47, 16  ;;  %v3182_v39 = vld [vmem:[%s2884_s29 + $0x2c] sm:$0x1] }
  0x2a   : > { %v478_v59 = vrot.slane %v476_v52, 4  ;;  %v387_v63 = vrot.slane %v386_v55, 4  ;;  %v489_v3 = vshrl.u32 %v2970_v47, 16  ;;  %v495_v4 = vshll.u32 %v2977_v51, 16 }
  0x2b   : > { %v481_v0 = vrot.slane %v479_v56, 5  ;;  %v677_v6 = vpack.c.b16 %v646_v57, %v645_v54  ;;  %v397_v7 = vrot.slane %v396_v58, 4  ;;  %v487_v8 = vrot.slane %v485_v60, 5  ;;  %v3015_v58 = vld [vmem:[%s2884_s29 + $0x48] sm:$0xf] }
  0x2c   : > { %v392_v13 = vsel %vm2911_vm3, %v387_v63, %v391_v46  ;;  %v491_v15 = vrot.slane %v489_v3, 4  ;;  %v497_v16 = vrot.slane %v495_v4, 5  ;;  %v572_v22 = vshrl.u32 %v240_v5, 16  ;;  %v3020_v3 = vld [vmem:[%s2884_s29 + $0x4c] sm:$0xf] }
  0x2d   : > { %v482_v14 = vor.u32 %v481_v0, %v478_v59  ;;  %2498 = vmatmul.msk.bf16.vlgmr.msra.gmra.mxu0 %vm693_vm4, %v677_v6  ;;  %v402_v20 = vsel %vm2911_vm3, %v397_v7, %v401_v50  ;;  %v655_v21 = vunpack.c.l.b16 %v392_v13  ;;  %v575_v25 = vshll.u32 %v240_v5, 16 }
  0x2e   : > { %v656_v26 = vunpack.c.l.b16 %v402_v20  ;;  %v492_v28 = vor.u32 %v491_v15, %v487_v8  ;;  %v581_v30 = vshll.u32 %v241_v9, 16  ;;  %v574_v31 = vrot.slane %v572_v22, 4  ;;  %v3027_v15 = vld [vmem:[%s2884_s29 + $0x50] sm:$0x1] }
  0x2f   : > { %v483_v27 = vrot.slane %v482_v14, 4  ;;  %v577_v32 = vrot.slane %v575_v25, 5  ;;  %v585_v33 = vshrl.u32 %v241_v9, 16  ;;  %v591_v34 = vshll.u32 %v242_v17, 16 }
  0x30   : > { %v2997_v37 = vpack.c.b16 %v656_v26, %v655_v21  ;;  %v493_v41 = vrot.slane %v492_v28, 4  ;;  %v583_v42 = vrot.slane %v581_v30, 5  ;;  %v284_v52 = vshrl.u32 %v2995_v35, 16  ;;  %v3038_v28 = vld [vmem:[%s2884_s29 + $0x78] sm:$0xf] }
  0x31   : > { %v488_v40 = vsel %vm2911_vm3, %v483_v27, %v487_v8  ;;  %v578_v45 = vor.u32 %v577_v32, %v574_v31  ;;  %v587_v46 = vrot.slane %v585_v33, 4  ;;  %v593_v50 = vrot.slane %v591_v34, 5  ;;  %v3042_v34 = vld [vmem:[%s2884_s29 + $0x7c] sm:$0xf] }
  0x32   : > { %v663_v44 = vunpack.c.l.b16 %v488_v40  ;;  %2503 = vmatmul.msk.bf16.gmra.mxu1 %vm693_vm4, %v2997_v37  ;;  %v498_v49 = vsel %vm2911_vm3, %v493_v41, %v497_v16  ;;  %v287_v53 = vshll.u32 %v2995_v35, 16  ;;  %v293_v57 = vshll.u32 %v3002_v43, 16 }
  0x33   : > { %v664_v54 = vunpack.c.l.b16 %v498_v49  ;;  %v579_v55 = vrot.slane %v578_v45, 4  ;;  %v588_v56 = vor.u32 %v587_v46, %v583_v42  ;;  %v286_v59 = vrot.slane %v284_v52, 4 }
  0x34   : > { %v289_v60 = vrot.slane %v287_v53, 5  ;;  %v297_v63 = vshrl.u32 %v3002_v43, 16  ;;  %v303_v0 = vshll.u32 %v3005_v48, 16  ;;  %v295_v7 = vrot.slane %v293_v57, 5 }
  0x35   : > { %v3022_v4 = vpack.c.b16 %v664_v54, %v663_v44  ;;  %v584_v5 = vsel %vm2911_vm3, %v579_v55, %v583_v42  ;;  %v589_v6 = vrot.slane %v588_v56, 4  ;;  %v404_v17 = vshrl.u32 %v3015_v58, 16 }
  0x36   : > { %v671_v8 = vunpack.c.l.b16 %v584_v5  ;;  %v290_v9 = vor.u32 %v289_v60, %v286_v59  ;;  %v299_v13 = vrot.slane %v297_v63, 4  ;;  %v305_v14 = vrot.slane %v303_v0, 5 }
  0x37   : > { %2507 = vmatmul.msk.bf16.gmra.mxu2 %vm693_vm4, %v3022_v4  ;;  %v594_v16 = vsel %vm2911_vm3, %v589_v6, %v593_v50  ;;  %v407_v20 = vshll.u32 %v3015_v58, 16  ;;  %v413_v21 = vshll.u32 %v3020_v3, 16  ;;  %v417_v27 = vshrl.u32 %v3020_v3, 16  ;;  %v3049_v50 = vld [vmem:[%s2884_s29 + $0x80] sm:$0x1] }
  0x38   : > { %v672_v22 = vunpack.c.l.b16 %v594_v16  ;;  %v291_v25 = vrot.slane %v290_v9, 4  ;;  %v300_v26 = vor.u32 %v299_v13, %v295_v7  ;;  %v406_v30 = vrot.slane %v404_v17, 4  ;;  %v3068_v16 = vld [vmem:[%s2884_s29 + $0xac] sm:$0xf]  ;;  %v3071_v17 = vld [vmem:[%s2884_s29 + $0xb0] sm:$0x1] }
  0x39   : > { %v409_v31 = vrot.slane %v407_v20, 5  ;;  %v415_v32 = vrot.slane %v413_v21, 5  ;;  %v423_v33 = vshll.u32 %v3027_v15, 16  ;;  %v419_v44 = vrot.slane %v417_v27, 4  ;;  %4109 = vst [vmem:[#allocation6_spill] sm:$0xff] %v3068_v16 }
  0x3a   : > { %v3044_v40 = vpack.c.b16 %v672_v22, %v671_v8  ;;  %v296_v41 = vsel %vm2911_vm3, %v291_v25, %v295_v7  ;;  %v301_v42 = vrot.slane %v300_v26, 4  ;;  %v500_v52 = vshrl.u32 %v3038_v28, 16  ;;  %v3061_v8 = vld [vmem:[%s2884_s29 + $0xa8] sm:$0xf]  ;;  %4110 = vst [vmem:[#allocation7_spill] sm:$0xff] %v3071_v17 }
  0x3b   : > { %v647_v45 = vunpack.c.l.b16 %v296_v41  ;;  %v410_v46 = vor.u32 %v409_v31, %v406_v30  ;;  %v425_v49 = vrot.slane %v423_v33, 5  ;;  %v420_v54 = vor.u32 %v419_v44, %v415_v32  ;;  %4108 = vst [vmem:[#allocation5_spill] sm:$0xff] %v3061_v8 }
  0x3c   : > { %4107 = vst [vmem:[#allocation4_spill] sm:$0xff] %v3044_v40  ;;  %2511 = vmatmul.msk.bf16.gmra.mxu3 %vm693_vm4, %v3044_v40  ;;  %v306_v53 = vsel %vm2911_vm3, %v301_v42, %v305_v14  ;;  %v503_v55 = vshll.u32 %v3038_v28, 16  ;;  %v509_v56 = vshll.u32 %v3042_v34, 16  ;;  %v502_v60 = vrot.slane %v500_v52, 4  ;;  %v3085_v52 = vld [vmem:[%s2884_s29 + $0x18] sm:$0xf] }
  0x3d   : > { %v648_v57 = vunpack.c.l.b16 %v306_v53  ;;  %v411_v59 = vrot.slane %v410_v46, 4  ;;  %v513_v63 = vshrl.u32 %v3042_v34, 16  ;;  %v421_v0 = vrot.slane %v420_v54, 4  ;;  %v3171_v40 = vld [vmem:[%s2884_s29 + $0x24] sm:$0xf] }
  0x3e   : > { %v505_v5 = vrot.slane %v503_v55, 5  ;;  %v511_v6 = vrot.slane %v509_v56, 5  ;;  %v519_v7 = vshll.u32 %v3049_v50, 16  ;;  %v596_v30 = vshrl.u32 %v3061_v8, 16  ;;  %v3090_v56 = vld [vmem:[%s2884_s29 + $0x1c] sm:$0xf] }
  0x3f   : > { %v3063_v9 = vpack.c.b16 %v648_v57, %v647_v45  ;;  %v416_v13 = vsel %vm2911_vm3, %v411_v59, %v415_v32  ;;  %v515_v14 = vrot.slane %v513_v63, 4  ;;  %v426_v20 = vsel %vm2911_vm3, %v421_v0, %v425_v49  ;;  %v3093_v57 = vld [vmem:[%s2884_s29 + $0x20] sm:$0x1] }
  0x40   : > { %v657_v21 = vunpack.c.l.b16 %v416_v13  ;;  %v506_v22 = vor.u32 %v505_v5, %v502_v60  ;;  %v521_v25 = vrot.slane %v519_v7, 5  ;;  %v658_v26 = vunpack.c.l.b16 %v426_v20 }
  0x41   : > { %2499 = vmatmul.msk.bf16.gmra.mxu0 %vm693_vm4, %v3063_v9  ;;  %v516_v27 = vor.u32 %v515_v14, %v511_v6  ;;  %v599_v31 = vshll.u32 %v3061_v8, 16  ;;  %v605_v33 = vshll.u32 %v3068_v16, 16  ;;  %v609_v41 = vshrl.u32 %v3068_v16, 16 }
  0x42   : > { %v507_v32 = vrot.slane %v506_v22, 4  ;;  %v615_v42 = vshll.u32 %v3071_v17, 16  ;;  %v3082_v44 = vpack.c.b16 %v658_v26, %v657_v21  ;;  %v598_v46 = vrot.slane %v596_v30, 4  ;;  %v3105_v26 = vld [vmem:[%s2884_s29 + $0x54] sm:$0xf] }
  0x43   : > { %v517_v45 = vrot.slane %v516_v27, 4  ;;  %v601_v49 = vrot.slane %v599_v31, 5  ;;  %v607_v54 = vrot.slane %v605_v33, 5  ;;  %v611_v55 = vrot.slane %v609_v41, 4  ;;  %v3149_v17 = vld [vmem:[%s2884_s29 + $0xb4] sm:$0xf] }
  0x44   : > { %4111 = vst [vmem:[#allocation8_spill] sm:$0xff] %v3082_v44  ;;  %v512_v53 = vsel %vm2911_vm3, %v507_v32, %v511_v6  ;;  %2504 = vmatmul.msk.bf16.gmra.mxu1 %vm693_vm4, %v3082_v44  ;;  %v617_v0 = vrot.slane %v615_v42, 5  ;;  %v308_v6 = vshrl.u32 %v3085_v52, 16  ;;  %v311_v13 = vshll.u32 %v3085_v52, 16  ;;  %v3110_v32 = vld [vmem:[%s2884_s29 + $0x58] sm:$0xf] }
  0x45   : > { %v522_v59 = vsel %vm2911_vm3, %v517_v45, %v521_v25  ;;  %v665_v60 = vunpack.c.l.b16 %v512_v53  ;;  %v602_v63 = vor.u32 %v601_v49, %v598_v46  ;;  %v612_v7 = vor.u32 %v611_v55, %v607_v54  ;;  %v3115_v46 = vld [vmem:[%s2884_s29 + $0x5c] sm:$0x1]  ;;  %4114 = vst [vmem:[#allocation11_spill] sm:$0xff] %v3149_v17 }
  0x46   : > { %v666_v5 = vunpack.c.l.b16 %v522_v59  ;;  %v317_v20 = vshll.u32 %v3090_v56, 16  ;;  %v321_v21 = vshrl.u32 %v3090_v56, 16  ;;  %v327_v22 = vshll.u32 %v3093_v57, 16 }
  0x47   : > { %v603_v14 = vrot.slane %v602_v63, 4  ;;  %v613_v27 = vrot.slane %v612_v7, 4  ;;  %v310_v30 = vrot.slane %v308_v6, 4  ;;  %v313_v31 = vrot.slane %v311_v13, 5  ;;  %v3125_v7 = vld [vmem:[%s2884_s29 + $0x84] sm:$0xf] }
  0x48   : > { %v3107_v25 = vpack.c.b16 %v666_v5, %v665_v60  ;;  %v319_v41 = vrot.slane %v317_v20, 5  ;;  %v323_v42 = vrot.slane %v321_v21, 4  ;;  %v329_v45 = vrot.slane %v327_v22, 5  ;;  %4112 = vst [vmem:[#allocation9_spill] sm:$0xff] %v3125_v7 }
  0x49   : > { %v608_v33 = vsel %vm2911_vm3, %v603_v14, %v607_v54  ;;  %v618_v49 = vsel %vm2911_vm3, %v613_v27, %v617_v0  ;;  %v314_v55 = vor.u32 %v313_v31, %v310_v30  ;;  %v428_v59 = vshrl.u32 %v3105_v26, 16  ;;  %v3132_v30 = vld [vmem:[%s2884_s29 + $0x88] sm:$0xf] }
  0x4a   : > { %2508 = vmatmul.msk.bf16.gmra.mxu2 %vm693_vm4, %v3107_v25  ;;  %v673_v53 = vunpack.c.l.b16 %v608_v33  ;;  %v674_v60 = vunpack.c.l.b16 %v618_v49  ;;  %v324_v63 = vor.u32 %v323_v42, %v319_v41  ;;  %v431_v54 = vshll.u32 %v3105_v26, 16  ;;  %v3137_v49 = vld [vmem:[%s2884_s29 + $0x8c] sm:$0x1] }
  0x4b   : > { %v437_v5 = vshll.u32 %v3110_v32, 16  ;;  %v315_v6 = vrot.slane %v314_v55, 4  ;;  %v430_v13 = vrot.slane %v428_v59, 4  ;;  %v441_v14 = vshrl.u32 %v3110_v32, 16 }
  0x4c   : > { %v447_v0 = vshll.u32 %v3115_v46, 16  ;;  %v3129_v20 = vpack.c.b16 %v674_v60, %v673_v53  ;;  %v325_v21 = vrot.slane %v324_v63, 4  ;;  %v433_v22 = vrot.slane %v431_v54, 5 }
  0x4d   : > { %v439_v27 = vrot.slane %v437_v5, 5  ;;  %v320_v31 = vsel %vm2911_vm3, %v315_v6, %v319_v41  ;;  %v443_v33 = vrot.slane %v441_v14, 4  ;;  %v524_v55 = vshrl.u32 %v3125_v7, 16 }
  0x4e   : > { %4113 = vst [vmem:[#allocation10_spill] sm:$0xff] %v3129_v20  ;;  %v449_v42 = vrot.slane %v447_v0, 5  ;;  %2512 = vmatmul.msk.bf16.gmra.mxu3 %vm693_vm4, %v3129_v20  ;;  %v330_v53 = vsel %vm2911_vm3, %v325_v21, %v329_v45  ;;  %v649_v59 = vunpack.c.l.b16 %v320_v31  ;;  %v434_v60 = vor.u32 %v433_v22, %v430_v13  ;;  %v3154_v22 = vld [vmem:[%s2884_s29 + $0xb8] sm:$0xf] }
  0x4f   : > { %v527_v63 = vshll.u32 %v3125_v7, 16  ;;  %v650_v54 = vunpack.c.l.b16 %v330_v53  ;;  %v444_v41 = vor.u32 %v443_v33, %v439_v27  ;;  %v526_v5 = vrot.slane %v524_v55, 4  ;;  %4115 = vst [vmem:[#allocation12_spill] sm:$0xff] %v3154_v22 }
  0x50   : > { %v533_v6 = vshll.u32 %v3132_v30, 16  ;;  %v435_v14 = vrot.slane %v434_v60, 4  ;;  %v537_v8 = vshrl.u32 %v3132_v30, 16  ;;  %v543_v20 = vshll.u32 %v3137_v49, 16  ;;  %v3159_v60 = vld [vmem:[%s2884_s29 + $0xbc] sm:$0x1] }
  0x51   : > { %v529_v0 = vrot.slane %v527_v63, 5  ;;  %v3151_v45 = vpack.c.b16 %v650_v54, %v649_v59  ;;  %v445_v21 = vrot.slane %v444_v41, 4  ;;  %4116 = vst [vmem:[#allocation13_spill] sm:$0xff] %v3159_v60  ;;  %v620_v54 = vshrl.u32 %v3149_v17, 16 }
  0x52   : > { %v535_v13 = vrot.slane %v533_v6, 5  ;;  %v440_v31 = vsel %vm2911_vm3, %v435_v14, %v439_v27  ;;  %v539_v55 = vrot.slane %v537_v8, 4  ;;  %v545_v53 = vrot.slane %v543_v20, 5 }
  0x53   : > { %v530_v33 = vor.u32 %v529_v0, %v526_v5  ;;  %2500 = vmatmul.msk.bf16.gmra.mxu0 %vm693_vm4, %v3151_v45  ;;  %v450_v59 = vsel %vm2911_vm3, %v445_v21, %v449_v42  ;;  %v659_v63 = vunpack.c.l.b16 %v440_v31  ;;  %v623_v41 = vshll.u32 %v3149_v17, 16 }
  0x54   : > { %v660_v6 = vunpack.c.l.b16 %v450_v59  ;;  %v540_v5 = vor.u32 %v539_v55, %v535_v13  ;;  %v629_v8 = vshll.u32 %v3154_v22, 16  ;;  %v622_v20 = vrot.slane %v620_v54, 4 }
  0x55   : > { %v531_v27 = vrot.slane %v530_v33, 4  ;;  %v625_v14 = vrot.slane %v623_v41, 5  ;;  %v633_v0 = vshrl.u32 %v3154_v22, 16  ;;  %v639_v16 = vshll.u32 %v3159_v60, 16  ;;  %v3178_v33 = vld [vmem:[%s2884_s29 + $0x28] sm:$0xf] }
  0x56   : > { %v3173_v42 = vpack.c.b16 %v660_v6, %v659_v63  ;;  %v541_v31 = vrot.slane %v540_v5, 4  ;;  %v631_v59 = vrot.slane %v629_v8, 5  ;;  %v1079_v55 = vrot.slane %v2931_v2, 5 }
  0x57   : > { %v536_v21 = vsel %vm2911_vm3, %v531_v27, %v535_v13  ;;  %v626_v54 = vor.u32 %v625_v14, %v622_v20  ;;  %v635_v41 = vrot.slane %v633_v0, 4  ;;  %v641_v6 = vrot.slane %v639_v16, 5 }
  0x58   : > { %4117 = vst [vmem:[#allocation14_spill] sm:$0xff] %v3173_v42  ;;  %v667_v17 = vunpack.c.l.b16 %v536_v21  ;;  %2505 = vmatmul.msk.bf16.gmra.mxu1 %vm693_vm4, %v3173_v42  ;;  %v546_v63 = vsel %vm2911_vm3, %v541_v31, %v545_v53  ;;  %v332_v13 = vshrl.u32 %v3171_v40, 16  ;;  %v335_v27 = vshll.u32 %v3171_v40, 16 }
  0x59   : > { %v668_v5 = vunpack.c.l.b16 %v546_v63  ;;  %v627_v8 = vrot.slane %v626_v54, 4  ;;  %v636_v60 = vor.u32 %v635_v41, %v631_v59  ;;  %v341_v2 = vshll.u32 %v3178_v33, 16  ;;  %v2683_v54 = vld [vmem:[%s4060_s1 + $0xc] sm:$0x3]  ;;  %v2704_v41 = vld [vmem:[%s4060_s1 + $0xe] sm:$0x3] }
  0x5a   : > { %v334_v20 = vrot.slane %v332_v13, 4  ;;  %v337_v14 = vrot.slane %v335_v27, 5  ;;  %v345_v0 = vshrl.u32 %v3178_v33, 16  ;;  %v351_v21 = vshll.u32 %v3182_v39, 16 }
  0x5b   : > { %v3193_v22 = vpack.c.b16 %v668_v5, %v667_v17  ;;  %v632_v16 = vsel %vm2911_vm3, %v627_v8, %v631_v59  ;;  %v637_v53 = vrot.slane %v636_v60, 4  ;;  %v343_v31 = vrot.slane %v341_v2, 5  ;;  %v2666_v17 = vld [vmem:[%s4060_s1 + $0xa] sm:$0x3]  ;;  %v2722_v60 = vld [vmem:[%s4060_s1 + $0x10] sm:$0x3] }
  0x5c   : > { %v675_v63 = vunpack.c.l.b16 %v632_v16  ;;  %v338_v13 = vor.u32 %v337_v14, %v334_v20  ;;  %v347_v27 = vrot.slane %v345_v0, 4  ;;  %v353_v7 = vrot.slane %v351_v21, 5 }
  0x5d   : > { %4118 = vst [vmem:[#allocation15_spill] sm:$0xff] %v3193_v22  ;;  %2509 = vmatmul.msk.bf16.gmra.mxu2 %vm693_vm4, %v3193_v22  ;;  %v642_v59 = vsel %vm2911_vm3, %v637_v53, %v641_v6  ;;  %v2594_v5 = vrot.slane %v2921_v61, 9  ;;  %v1076_v0 = vrot.slane %v2928_v1, 5  ;;  %v1849_v21 = vsel %vm742_vm0, %v2683_v54, 0 }
  0x5e   : > { %v676_v8 = vunpack.c.l.b16 %v642_v59  ;;  %v339_v2 = vrot.slane %v338_v13, 4  ;;  %v348_v20 = vor.u32 %v347_v27, %v343_v31  ;;  %v2005_v16 = vsel %vm742_vm0, %v2704_v41, 0  ;;  %1858 = vmatpush.bf16.msra.mxu2 %v1849_v21  ;;  %v2743_v21 = vld [vmem:[%s2884_s29 + $0xc] sm:$0xff] }
  0x5f   : > { %v1715_v22 = vsel %vm742_vm0, %v2666_v17, 0  ;;  %v2145_v6 = vsel %vm742_vm0, %v2722_v60, 0  ;;  %v1077_v27 = vsel %vm3214_vm7, %v2594_v5, %v1076_v0  ;;  %2014 = vmatpush.bf16.msra.mxu3 %v2005_v16  ;;  %v1078_v54 = vrot.slane %v1076_v0, 4 }
  0x60   : > { %v3223_v53 = vpack.c.b16 %v676_v8, %v675_v63  ;;  %v344_v61 = vsel %vm2911_vm3, %v339_v2, %v343_v31  ;;  %v349_v13 = vrot.slane %v348_v20, 4  ;;  %1724 = vmatpush.bf16.msra.mxu1 %v1715_v22  ;;  %2154 = vmatpush.bf16.msra.mxu0 %v2145_v6  ;;  %v2595_v41 = vrot.slane %v2995_v35, 9  ;;  %v2742_v22 = vld [vmem:[%s2884_s29] sm:$0xff]  ;;  %v3260_v6 = vld [vmem:[%s2884_s29 + $0x18] sm:$0xff] }
  0x61   : > { %v651_v1 = vunpack.c.l.b16 %v344_v61  ;;  %v1188_v31 = vunpack.c.l.b16 %v1077_v27  ;;  %v1083_v17 = vrot.slane %v3002_v43, 5  ;;  %v1086_v60 = vrot.slane %v3005_v48, 5 }
  0x62   : > { %2513 = vmatmul.msk.bf16.gmra.mxu3 %vm693_vm4, %v3223_v53  ;;  %v354_v63 = vsel %vm2911_vm3, %v349_v13, %v353_v7  ;;  %v1080_v5 = vsel %vm3214_vm7, %v1078_v54, %v1079_v55  ;;  %v1090_v16 = vrot.slane %v3090_v56, 5  ;;  %v2596_v61 = vrot.slane %v3085_v52, 9 }
  0x63   : > { %v652_v59 = vunpack.c.l.b16 %v354_v63  ;;  %v1189_v8 = vunpack.c.l.b16 %v1080_v5  ;;  %v1084_v35 = vsel %vm3214_vm7, %v2595_v41, %v1083_v17  ;;  %v1085_v2 = vrot.slane %v1083_v17, 4  ;;  %v3280_v41 = vld [vmem:[%s2884_s29 + $0x24] sm:$0xff] }
  0x64   : > { %v1190_v7 = vunpack.c.l.b16 %v1084_v35  ;;  %v1092_v13 = vrot.slane %v1090_v16, 4  ;;  %v1093_v27 = vrot.slane %v3093_v57, 5  ;;  %v1097_v57 = vrot.slane %v3178_v33, 5 }
  0x65   : > { %v3241_v20 = vpack.c.b16 %v652_v59, %v651_v1  ;;  %v1220_v0 = vpack.c.b16 %v1189_v8, %v1188_v31  ;;  %v1087_v43 = vsel %vm3214_vm7, %v1085_v2, %v1086_v60  ;;  %v2597_v63 = vrot.slane %v3171_v40, 9  ;;  %v3302_v8 = vld [vmem:[%s2884_s29 + $0x30] sm:$0xff] }
  0x66   : > { %v1191_v48 = vunpack.c.l.b16 %v1087_v43  ;;  %v1094_v56 = vsel %vm3214_vm7, %v1092_v13, %v1093_v27  ;;  %v1099_v31 = vrot.slane %v1097_v57, 4  ;;  %v1100_v17 = vrot.slane %v3182_v39, 5  ;;  %v3330_v27 = vld [vmem:[%s2884_s29 + $0x3c] sm:$0xff] }
  0x67   : > { %2501 = vmatmul.msk.bf16.gmra.mxu0 %vm693_vm4, %v3241_v20  ;;  %v1193_v54 = vunpack.c.l.b16 %v1094_v56  ;;  %v1098_v60 = vsel %vm3214_vm7, %v2597_v63, %v1097_v57  ;;  %v1104_v39 = vrot.slane %v2890_v11, 5  ;;  %v2598_v35 = vrot.slane %v2887_v10, 9 }
  0x68   : > { %2578 = vmatmul.msk.bf16.vlgmr.msrb.gmra.mxu1 %vm693_vm4, %v2742_v22  ;;  %v3248_v55 = vpack.c.b16 %v1191_v48, %v1190_v7  ;;  %v1101_v33 = vsel %vm3214_vm7, %v1099_v31, %v1100_v17  ;;  %v1194_v59 = vunpack.c.l.b16 %v1098_v60  ;;  %v1107_v7 = vrot.slane %v2893_v12, 5 }
  0x69   : > { %v1195_v5 = vunpack.c.l.b16 %v1101_v33  ;;  %v1106_v2 = vrot.slane %v1104_v39, 4  ;;  %v1111_v13 = vrot.slane %v2950_v24, 5  ;;  %v2599_v56 = vrot.slane %v2947_v23, 9 }
  0x6b   : > { %v3294_v40 = vpack.c.b16 %v1195_v5, %v1194_v59  ;;  %v1108_v11 = vsel %vm3214_vm7, %v1106_v2, %v1107_v7  ;;  %v1112_v24 = vsel %vm3214_vm7, %v2599_v56, %v1111_v13  ;;  %v1118_v5 = vrot.slane %v3020_v3, 5 }
  0x6c   : > { %v1198_v23 = vunpack.c.l.b16 %v1112_v24  ;;  %v2600_v7 = vrot.slane %v3015_v58, 9  ;;  %v1125_v24 = vrot.slane %v3110_v32, 5 }
  0x6d   : > { %2611 = vmatmul.msk.bf16.vlgmr.msrb.gmra.mxu2 %vm693_vm4, %v1220_v0  ;;  %v1105_v0 = vsel %vm3214_vm7, %v2598_v35, %v1104_v39  ;;  %v3364_v35 = vld [vmem:[%s2884_s29 + $0x48] sm:$0xff] }
  0x6e   : > { %v1196_v48 = vunpack.c.l.b16 %v1105_v0  ;;  %4123 = vst [vmem:[#allocation18_spill] sm:$0xff] %v3364_v35  ;;  %v1120_v0 = vrot.slane %v1118_v5, 4 }
  0x72   : > { %2632 = vmatmul.msk.bf16.vlgmr.msrb.gmra.mxu3 %vm693_vm4, %v2743_v21 }
  0x77   : > { %2649 = vmatmul.msk.bf16.vlgmr.msrb.gmra.mxu0 %vm693_vm4, %v3063_v9  ;;  %v1091_v9 = vsel %vm3214_vm7, %v2596_v61, %v1090_v16 }
  0x78   : > { %2579 = vmatmul.msk.bf16.gmra.mxu1 %vm693_vm4, %v2743_v21  ;;  %v1192_v1 = vunpack.c.l.b16 %v1091_v9  ;;  %v1197_v21 = vunpack.c.l.b16 %v1108_v11  ;;  %v1121_v11 = vrot.slane %v3027_v15, 5 }
  0x7a   : > { %v3274_v52 = vpack.c.b16 %v1193_v54, %v1192_v1  ;;  %v3322_v12 = vpack.c.b16 %v1197_v21, %v1196_v48  ;;  %v1113_v1 = vrot.slane %v1111_v13, 4  ;;  %v1114_v54 = vrot.slane %v2955_v29, 5 }
  0x7b   : > { %v1119_v21 = vsel %vm3214_vm7, %v2600_v7, %v1118_v5  ;;  %v1122_v13 = vsel %vm3214_vm7, %v1120_v0, %v1121_v11  ;;  %v2601_v5 = vrot.slane %v3105_v26, 9  ;;  %v1127_v7 = vrot.slane %v1125_v24, 4 }
  0x7c   : > { %v1115_v63 = vsel %vm3214_vm7, %v1113_v1, %v1114_v54  ;;  %v1200_v56 = vunpack.c.l.b16 %v1119_v21  ;;  %v1201_v1 = vunpack.c.l.b16 %v1122_v13  ;;  %v1128_v0 = vrot.slane %v3115_v46, 5 }
  0x7d   : > { %2612 = vmatmul.msk.bf16.gmra.mxu2 %vm693_vm4, %v3248_v55  ;;  %v1199_v60 = vunpack.c.l.b16 %v1115_v63  ;;  %v1126_v32 = vsel %vm3214_vm7, %v2601_v5, %v1125_v24  ;;  %v1132_v5 = vrot.slane %v2902_v19, 5 }
  0x7e   : > { %v3388_v54 = vpack.c.b16 %v1201_v1, %v1200_v56  ;;  %v1129_v13 = vsel %vm3214_vm7, %v1127_v7, %v1128_v0  ;;  %v1202_v56 = vunpack.c.l.b16 %v1126_v32  ;;  %v2788_v32 = vld [vmem:[%s2884_s29 + $0x68] sm:$0x1] }
  0x7f   : > { %v3354_v33 = vpack.c.b16 %v1199_v60, %v1198_v23  ;;  %v3398_v60 = vld [vmem:[%s2884_s29 + $0x54] sm:$0xff]  ;;  %v1203_v46 = vunpack.c.l.b16 %v1129_v13  ;;  %v1135_v13 = vrot.slane %v2788_v32, 5 }
  0x80   : > { %4126 = vst [vmem:[#allocation21_spill] sm:$0xff] %v3388_v54 }
  0x81   : > { %4127 = vst [vmem:[#allocation22_spill] sm:$0xff] %v3398_v60 }
  0x82   : > { %2633 = vmatmul.msk.bf16.gmra.mxu3 %vm693_vm4, %v3260_v6 }
  0x87   : > { %2650 = vmatmul.msk.bf16.gmra.mxu0 %vm693_vm4, %v3151_v45 }
  0x88   : > { %2580 = vmatmul.msk.bf16.gmra.mxu1 %vm693_vm4, %v3260_v6 }
  0x8d   : > { %2613 = vmatmul.msk.bf16.gmra.mxu2 %vm693_vm4, %v3274_v52 }
  0x92   : > { %2634 = vmatmul.msk.bf16.gmra.mxu3 %vm693_vm4, %v3280_v41 }
  0x97   : > { %2651 = vmatmul.msk.bf16.gmra.mxu0 %vm693_vm4, %v3241_v20 }
  0x98   : > { %2581 = vmatmul.msk.bf16.gmra.mxu1 %vm693_vm4, %v3280_v41 }
  0x9d   : > { %v3297_v22 = vpop.f32.mrf.mxu1  ;;  %2614 = vmatmul.msk.bf16.gmra.mxu2 %vm693_vm4, %v3294_v40 }
  0xa2   : > { %2635 = vmatmul.msk.bf16.gmra.mxu3 %vm693_vm4, %v3302_v8 }
  0xa5   : > { %v3312_v43 = vpop.f32.mrf.mxu1 }
  0xa7   : > { %v3314_v16 = vpop.f32.mrf.mxu2  ;;  %2652 = vmatmul.msk.bf16.gmra.mxu0 %vm693_vm4, %v2923_v62 }
  0xa8   : > { %2582 = vmatmul.msk.bf16.gmra.mxu1 %vm693_vm4, %v3302_v8 }
  0xaa   : > { %v3320_v10 = vpop.f32.mrf.mxu0 }
  0xab   : > { %v3324_v61 = vpop.f32.mrf.mxu3 }
  0xac   : > { %4121 = vst [vmem:[#allocation16_spill] sm:$0xff] %v3324_v61 }
  0xad   : > { %2615 = vmatmul.msk.bf16.gmra.mxu2 %vm693_vm4, %v3322_v12 }
  0xaf   : > { %v3332_v9 = vpop.f32.mrf.mxu1  ;;  %v3336_v57 = vpop.f32.mrf.mxu2 }
  0xb2   : > { %2636 = vmatmul.msk.bf16.gmra.mxu3 %vm693_vm4, %v3330_v27  ;;  %v3344_v31 = vpop.f32.mrf.mxu0 }
  0xb3   : > { %v3346_v17 = vpop.f32.mrf.mxu3 }
  0xb4   : > { %4122 = vst [vmem:[#allocation17_spill] sm:$0xff] %v3346_v17 }
  0xb7   : > { %2653 = vmatmul.msk.bf16.gmra.mxu0 %vm693_vm4, %v2997_v37  ;;  %v3350_v29 = vpop.f32.mrf.mxu1 }
  0xb8   : > { %2583 = vmatmul.msk.bf16.gmra.mxu1 %vm693_vm4, %v3330_v27 }
  0xba   : > { %v3356_v59 = vpop.f32.mrf.mxu2 }
  0xbd   : > { %2616 = vmatmul.msk.bf16.gmra.mxu2 %vm693_vm4, %v3354_v33 }
  0xbe   : > { %v3359_v39 = vpop.f32.mrf.mxu0 }
  0xbf   : > { %v3366_v2 = vpop.f32.mrf.mxu3 }
  0xc0   : > { %4124 = vst [vmem:[#allocation19_spill] sm:$0xff] %v3366_v2 }
  0xc1   : > { %v3370_v48 = vpop.f32.mrf.mxu1 }
  0xc2   : > { %2637 = vmatmul.msk.bf16.gmra.mxu3 %vm693_vm4, %v3364_v35  ;;  %v3374_v3 = vpop.f32.mrf.mxu2 }
  0xc6   : > { %v3380_v58 = vpop.f32.mrf.mxu0 }
  0xc7   : > { %2654 = vmatmul.msk.bf16.gmra.mxu0 %vm693_vm4, %v3082_v44  ;;  %v3384_v15 = vpop.f32.mrf.mxu3 }
  0xc8   : > { %4125 = vst [vmem:[#allocation20_spill] sm:$0xff] %v3384_v15  ;;  %2584 = vmatmul.msk.bf16.gmra.mxu1 %vm693_vm4, %v3364_v35  ;;  %v3433_v15 = vld [vmem:[%s2884_s29 + $0x60] sm:$0xff] }
  0xc9   : > { %v3391_v63 = vpop.f32.mrf.mxu1  ;;  %4131 = vst [vmem:[#allocation26_spill] sm:$0xff] %v3433_v15 }
  0xcd   : > { %v3393_v23 = vpop.f32.mrf.mxu2  ;;  %2617 = vmatmul.msk.bf16.gmra.mxu2 %vm693_vm4, %v3388_v54 }
  0xd0   : > { %v3402_v11 = vpop.f32.mrf.mxu0 }
  0xd1   : > { %v3404_v21 = vpop.f32.mrf.mxu3 }
  0xd2   : > { %4128 = vst [vmem:[#allocation23_spill] sm:$0xff] %v3404_v21  ;;  %2638 = vmatmul.msk.bf16.gmra.mxu3 %vm693_vm4, %v3398_v60  ;;  %v3420_v21 = vpack.c.b16 %v1203_v46, %v1202_v56 }
  0xd4   : > { %4129 = vst [vmem:[#allocation24_spill] sm:$0xff] %v3420_v21 }
  0xd5   : > { %v3412_v26 = vpop.f32.mrf.mxu1  ;;  %v3414_v1 = vpop.f32.mrf.mxu2 }
  0xd7   : > { %2655 = vmatmul.msk.bf16.gmra.mxu0 %vm693_vm4, %v3173_v42  ;;  %v2789_v42 = vld [vmem:[%s2884_s29 + $0x60] sm:$0xf] }
  0xd8   : > { %2585 = vmatmul.msk.bf16.gmra.mxu1 %vm693_vm4, %v3398_v60  ;;  %v3422_v24 = vpop.f32.mrf.mxu0  ;;  %v2602_v2 = vrot.slane %v2789_v42, 9  ;;  %v1134_v60 = vrot.slane %v1132_v5, 4 }
  0xd9   : > { %v3425_v7 = vpop.f32.mrf.mxu3 }
  0xda   : > { %4130 = vst [vmem:[#allocation25_spill] sm:$0xff] %v3425_v7  ;;  %v1133_v19 = vsel %vm3214_vm7, %v2602_v2, %v1132_v5  ;;  %v1136_v46 = vsel %vm3214_vm7, %v1134_v60, %v1135_v13  ;;  %v1139_v60 = vrot.slane %v2970_v47, 5 }
  0xdb   : > { %v1204_v17 = vunpack.c.l.b16 %v1133_v19  ;;  %v1205_v42 = vunpack.c.l.b16 %v1136_v46  ;;  %v3466_v19 = vld [vmem:[%s2884_s29 + $0x6c] sm:$0xff] }
  0xdd   : > { %2618 = vmatmul.msk.bf16.gmra.mxu2 %vm693_vm4, %v3420_v21  ;;  %v3429_v0 = vpop.f32.mrf.mxu1  ;;  %v3455_v2 = vpack.c.b16 %v1205_v42, %v1204_v17  ;;  %v1141_v17 = vrot.slane %v1139_v60, 4 }
  0xdf   : > { %4133 = vst [vmem:[#allocation28_spill] sm:$0xff] %v3455_v2 }
  0xe0   : > { %v3436_v56 = vpop.f32.mrf.mxu2 }
  0xe2   : > { %2639 = vmatmul.msk.bf16.gmra.mxu3 %vm693_vm4, %v3433_v15 }
  0xe4   : > { %v3444_v7 = vpop.f32.mrf.mxu0 }
  0xe5   : > { %v3446_v32 = vpop.f32.mrf.mxu3  ;;  %v975_v21 = vpop.f32.mrf.mxu1 }
  0xe6   : > { %4132 = vst [vmem:[#allocation27_spill] sm:$0xff] %v3446_v32  ;;  %v976_v54 = vadd.f32 %v975_v21, %v3320_v10  ;;  %v1142_v21 = vrot.slane %v2977_v51, 5  ;;  %v2603_v32 = vrot.slane %v2963_v38, 9 }
  0xe7   : > { %2656 = vmatmul.msk.bf16.gmra.mxu0 %vm693_vm4, %v2942_v18 }
  0xe8   : > { %v3451_v44 = vpop.f32.mrf.mxu2  ;;  %2586 = vmatmul.msk.bf16.gmra.mxu1 %vm693_vm4, %v3433_v15  ;;  %v1140_v47 = vsel %vm3214_vm7, %v2603_v32, %v1139_v60 }
  0xe9   : > { %v1206_v61 = vunpack.c.l.b16 %v1140_v47 }
  0xec   : > { %v3458_v5 = vpop.f32.mrf.mxu0 }
  0xed   : > { %v3460_v13 = vpop.f32.mrf.mxu3  ;;  %2619 = vmatmul.msk.bf16.gmra.mxu2 %vm693_vm4, %v3455_v2  ;;  %v977_v10 = vpop.f32.mrf.mxu1 }
  0xee   : > { %4134 = vst [vmem:[#allocation29_spill] sm:$0xff] %v3460_v13  ;;  %v978_v46 = vadd.f32 %v977_v10, %v3344_v31  ;;  %v1143_v13 = vsel %vm3214_vm7, %v1141_v17, %v1142_v21  ;;  %v1146_v21 = vrot.slane %v3042_v34, 5 }
  0xef   : > { %v1207_v35 = vunpack.c.l.b16 %v1143_v13  ;;  %v1149_v13 = vrot.slane %v3049_v50, 5 }
  0xf0   : > { %v1296_v42 = vpop.f32.mrf.mxu2 }
  0xf1   : > { %v1376_v18 = vadd.f32 %v1296_v42, %v976_v54  ;;  %v3483_v10 = vpack.c.b16 %v1207_v35, %v1206_v61  ;;  %v3490_v42 = vld [vmem:[%s2884_s29 + $0x78] sm:$0xff] }
  0xf2   : > { %2640 = vmatmul.msk.bf16.gmra.mxu3 %vm693_vm4, %v3466_v19 }
  0xf4   : > { %v1586_v2 = vpop.f32.mrf.mxu0 }
  0xf5   : > { %v1430_v51 = vpop.f32.mrf.mxu3  ;;  %v980_v15 = vpop.f32.mrf.mxu1 }
  0xf6   : > { %v1510_v31 = vadd.f32 %v1430_v51, %v1376_v18  ;;  %v981_v38 = vadd.f32 %v980_v15, %v3359_v39 }
  0xf7   : > { %2657 = vmatmul.msk.bf16.gmra.mxu0 %vm693_vm4, %v3022_v4 }
  0xf8   : > { %v1298_v54 = vpop.f32.mrf.mxu2  ;;  %2587 = vmatmul.msk.bf16.gmra.mxu1 %vm693_vm4, %v3466_v19  ;;  %v3481_v32 = vadd.f32 %v1586_v2, %v1510_v31  ;;  %v2604_v2 = vrot.slane %v3038_v28, 9 }
  0xf9   : > { %v1377_v60 = vadd.f32 %v1298_v54, %v978_v46  ;;  %v1148_v46 = vrot.slane %v1146_v21, 4 }
  0xfa   : > { %v1147_v50 = vsel %vm3214_vm7, %v2604_v2, %v1146_v21 }
  0xfb   : > { %v1150_v51 = vsel %vm3214_vm7, %v1148_v46, %v1149_v13  ;;  %v1156_v46 = vrot.slane %v3137_v49, 5 }
  0xfc   : > { %v1588_v17 = vpop.f32.mrf.mxu0 }
  0xfd   : > { %v1432_v18 = vpop.f32.mrf.mxu3  ;;  %2620 = vmatmul.msk.bf16.gmra.mxu2 %vm693_vm4, %v3483_v10  ;;  %v982_v39 = vpop.f32.mrf.mxu1 }
  0xfe   : > { %v1511_v15 = vadd.f32 %v1432_v18, %v1377_v60  ;;  %v983_v47 = vadd.f32 %v982_v39, %v3380_v58  ;;  %v1208_v58 = vunpack.c.l.b16 %v1147_v50  ;;  %v1209_v18 = vunpack.c.l.b16 %v1150_v51  ;;  %v3516_v50 = vld [vmem:[%s2884_s29 + $0x84] sm:$0xff] }
 0x100   : > { %v1301_v61 = vpop.f32.mrf.mxu2  ;;  %v3494_v35 = vadd.f32 %v1588_v17, %v1511_v15  ;;  %v3509_v13 = vpack.c.b16 %v1209_v18, %v1208_v58  ;;  %v1153_v15 = vrot.slane %v3132_v30, 5 }
 0x101   : > { %v1378_v34 = vadd.f32 %v1301_v61, %v981_v38 }
 0x102   : > { %2641 = vmatmul.msk.bf16.gmra.mxu3 %vm693_vm4, %v3490_v42 }
 0x104   : > { %v1591_v31 = vpop.f32.mrf.mxu0 }
 0x105   : > { %v1435_v54 = vpop.f32.mrf.mxu3  ;;  %v985_v60 = vpop.f32.mrf.mxu1 }
 0x106   : > { %v1512_v28 = vadd.f32 %v1435_v54, %v1378_v34  ;;  %v986_v17 = vadd.f32 %v985_v60, %v3402_v11 }
 0x107   : > { %2658 = vmatmul.msk.bf16.gmra.mxu0 %vm693_vm4, %v3107_v25 }
 0x108   : > { %v1303_v38 = vpop.f32.mrf.mxu2  ;;  %2588 = vmatmul.msk.bf16.gmra.mxu1 %vm693_vm4, %v3490_v42  ;;  %v3507_v21 = vadd.f32 %v1591_v31, %v1512_v28  ;;  %v4135_v31 = vld [vmem:[#allocation9_spill] sm:$0xff] }
 0x109   : > { %v1379_v39 = vadd.f32 %v1303_v38, %v983_v47  ;;  %v2605_v54 = vrot.slane %v4135_v31, 9  ;;  %v1155_v47 = vrot.slane %v1153_v15, 4 }
 0x10b   : > { %v1154_v49 = vsel %vm3214_vm7, %v2605_v54, %v1153_v15  ;;  %v1157_v18 = vsel %vm3214_vm7, %v1155_v47, %v1156_v46  ;;  %v2790_v54 = vld [vmem:[%s2884_s29 + $0x94] sm:$0xf] }
 0x10c   : > { %v1593_v2 = vpop.f32.mrf.mxu0  ;;  %v1160_v47 = vrot.slane %v2790_v54, 5 }
 0x10d   : > { %v1437_v61 = vpop.f32.mrf.mxu3  ;;  %2621 = vmatmul.msk.bf16.gmra.mxu2 %vm693_vm4, %v3509_v13  ;;  %v987_v11 = vpop.f32.mrf.mxu1 }
 0x10e   : > { %v1513_v34 = vadd.f32 %v1437_v61, %v1379_v39  ;;  %v988_v51 = vadd.f32 %v987_v11, %v3422_v24  ;;  %v1210_v39 = vunpack.c.l.b16 %v1154_v49  ;;  %v1211_v61 = vunpack.c.l.b16 %v1157_v18 }
 0x110   : > { %v1306_v60 = vpop.f32.mrf.mxu2  ;;  %v3520_v58 = vadd.f32 %v1593_v2, %v1513_v34  ;;  %v3535_v31 = vpack.c.b16 %v1211_v61, %v1210_v39 }
 0x111   : > { %v1380_v30 = vadd.f32 %v1306_v60, %v986_v17  ;;  %v4137_v17 = vld [vmem:[#allocation15_spill] sm:$0xff] }
 0x112   : > { %4136 = vst [vmem:[#allocation9_spill] sm:$0xff] %v3520_v58  ;;  %2642 = vmatmul.msk.bf16.gmra.mxu3 %vm693_vm4, %v3516_v50 }
 0x113   : > { %4139 = vst [vmem:[#allocation31_spill] sm:$0xff] %v3535_v31 }
 0x114   : > { %v1596_v28 = vpop.f32.mrf.mxu0 }
 0x115   : > { %v1440_v24 = vpop.f32.mrf.mxu3  ;;  %v990_v38 = vpop.f32.mrf.mxu1 }
 0x116   : > { %v1514_v11 = vadd.f32 %v1440_v24, %v1380_v30  ;;  %v991_v2 = vadd.f32 %v990_v38, %v3444_v7  ;;  %v2791_v30 = vld [vmem:[%s2884_s29 + $0x98] sm:$0x1]  ;;  %v3542_v38 = vld [vmem:[%s2884_s29 + $0x90] sm:$0xff] }
 0x117   : > { %2659 = vmatmul.msk.bf16.gmra.mxu0 %vm693_vm4, %v4137_v17  ;;  %v1163_v49 = vrot.slane %v2791_v30, 5  ;;  %4140 = vst [vmem:[#allocation32_spill] sm:$0xff] %v3542_v38 }
 0x118   : > { %v1308_v34 = vpop.f32.mrf.mxu2  ;;  %2589 = vmatmul.msk.bf16.gmra.mxu1 %vm693_vm4, %v3516_v50  ;;  %v3533_v15 = vadd.f32 %v1596_v28, %v1514_v11  ;;  %v2792_v28 = vld [vmem:[%s2884_s29 + $0x90] sm:$0xf] }
 0x119   : > { %v1381_v46 = vadd.f32 %v1308_v34, %v988_v51  ;;  %v2606_v11 = vrot.slane %v2792_v28, 9  ;;  %v1162_v51 = vrot.slane %v1160_v47, 4 }
 0x11a   : > { %4138 = vst [vmem:[#allocation30_spill] sm:$0xff] %v3533_v15 }
 0x11b   : > { %v1161_v54 = vsel %vm3214_vm7, %v2606_v11, %v1160_v47  ;;  %v2793_v11 = vld [vmem:[%s2884_s29 + $0xa0] sm:$0xf] }
 0x11c   : > { %v1598_v60 = vpop.f32.mrf.mxu0 }
 0x11d   : > { %v1442_v7 = vpop.f32.mrf.mxu3  ;;  %2622 = vmatmul.msk.bf16.gmra.mxu2 %vm693_vm4, %v3535_v31  ;;  %v992_v18 = vpop.f32.mrf.mxu1  ;;  %v2795_v31 = vld [vmem:[%s2884_s29 + $0x9c] sm:$0xf] }
 0x11e   : > { %v1515_v24 = vadd.f32 %v1442_v7, %v1381_v46  ;;  %v993_v58 = vadd.f32 %v992_v18, %v3458_v5  ;;  %v1164_v46 = vsel %vm3214_vm7, %v1162_v51, %v1163_v49  ;;  %v1212_v18 = vunpack.c.l.b16 %v1161_v54 }
 0x11f   : > { %v1213_v28 = vunpack.c.l.b16 %v1164_v46  ;;  %v1167_v51 = vrot.slane %v2793_v11, 5  ;;  %v2794_v46 = vld [vmem:[%s2884_s29 + $0xa4] sm:$0x1] }
 0x120   : > { %v1311_v39 = vpop.f32.mrf.mxu2  ;;  %v3546_v61 = vadd.f32 %v1598_v60, %v1515_v24  ;;  %v4142_v60 = vld [vmem:[#allocation3_spill] sm:$0xff] }
 0x121   : > { %v1382_v34 = vadd.f32 %v1311_v39, %v991_v2  ;;  %v3560_v49 = vpack.c.b16 %v1213_v28, %v1212_v18 }
 0x122   : > { %4141 = vst [vmem:[#allocation33_spill] sm:$0xff] %v3546_v61  ;;  %2643 = vmatmul.msk.bf16.gmra.mxu3 %vm693_vm4, %v3542_v38 }
 0x123   : > { %4144 = vst [vmem:[#allocation35_spill] sm:$0xff] %v3560_v49 }
 0x124   : > { %v1601_v30 = vpop.f32.mrf.mxu0 }
 0x125   : > { %v1445_v7 = vpop.f32.mrf.mxu3  ;;  %v995_v5 = vpop.f32.mrf.mxu1 }
 0x126   : > { %v1516_v15 = vadd.f32 %v1445_v7, %v1382_v34  ;;  %v1170_v7 = vrot.slane %v2794_v46, 5 }
 0x127   : > { %2660 = vmatmul.msk.bf16.gmra.mxu0 %vm693_vm4, %v4142_v60  ;;  %v3567_v60 = vld [vmem:[%s2884_s29 + $0x9c] sm:$0xff] }
 0x128   : > { %v1313_v2 = vpop.f32.mrf.mxu2  ;;  %2590 = vmatmul.msk.bf16.gmra.mxu1 %vm693_vm4, %v3542_v38  ;;  %v3558_v47 = vadd.f32 %v1601_v30, %v1516_v15  ;;  %4145 = vst [vmem:[#allocation36_spill] sm:$0xff] %v3567_v60  ;;  %v2607_v38 = vrot.slane %v2795_v31, 9  ;;  %v1169_v15 = vrot.slane %v1167_v51, 4 }
 0x129   : > { %v1383_v24 = vadd.f32 %v1313_v2, %v993_v58  ;;  %v996_v58 = vadd.f32 %v995_v5, %v3297_v22  ;;  %v4147_v5 = vld [vmem:[#allocation4_spill] sm:$0xff] }
 0x12a   : > { %4143 = vst [vmem:[#allocation34_spill] sm:$0xff] %v3558_v47  ;;  %v1168_v2 = vsel %vm3214_vm7, %v2607_v38, %v1167_v51 }
 0x12b   : > { %v1214_v31 = vunpack.c.l.b16 %v1168_v2 }
 0x12c   : > { %v1603_v39 = vpop.f32.mrf.mxu0 }
 0x12d   : > { %v1447_v54 = vpop.f32.mrf.mxu3  ;;  %2623 = vmatmul.msk.bf16.gmra.mxu2 %vm693_vm4, %v3560_v49  ;;  %v997_v34 = vpop.f32.mrf.mxu1 }
 0x12e   : > { %v1517_v61 = vadd.f32 %v1447_v54, %v1383_v24  ;;  %v1171_v24 = vsel %vm3214_vm7, %v1169_v15, %v1170_v7  ;;  %v4150_v15 = vld [vmem:[#allocation6_spill] sm:$0xff] }
 0x12f   : > { %v1215_v47 = vunpack.c.l.b16 %v1171_v24  ;;  %v4151_v24 = vld [vmem:[#allocation7_spill] sm:$0xff] }
 0x130   : > { %v1316_v30 = vpop.f32.mrf.mxu2  ;;  %v3571_v18 = vadd.f32 %v1603_v39, %v1517_v61  ;;  %v998_v61 = vadd.f32 %v997_v34, %v3312_v43  ;;  %v3593_v34 = vld [vmem:[%s2884_s29 + $0xa8] sm:$0xff] }
 0x131   : > { %v1384_v28 = vadd.f32 %v1316_v30, %v996_v58  ;;  %v3586_v7 = vpack.c.b16 %v1215_v47, %v1214_v31  ;;  %v1174_v58 = vrot.slane %v4150_v15, 5  ;;  %4152 = vst [vmem:[#allocation6_spill] sm:$0xff] %v3593_v34 }
 0x132   : > { %4146 = vst [vmem:[#allocation37_spill] sm:$0xff] %v3571_v18  ;;  %2644 = vmatmul.msk.bf16.gmra.mxu3 %vm693_vm4, %v3567_v60  ;;  %v4153_v18 = vld [vmem:[#allocation5_spill] sm:$0xff] }
 0x133   : > { %4149 = vst [vmem:[#allocation39_spill] sm:$0xff] %v3586_v7 }
 0x134   : > { %v1606_v11 = vpop.f32.mrf.mxu0 }
 0x135   : > { %v1450_v54 = vpop.f32.mrf.mxu3  ;;  %v1000_v46 = vpop.f32.mrf.mxu1 }
 0x136   : > { %v1518_v22 = vadd.f32 %v1450_v54, %v1384_v28  ;;  %v1177_v54 = vrot.slane %v4151_v24, 5 }
 0x137   : > { %2661 = vmatmul.msk.bf16.gmra.mxu0 %vm693_vm4, %v4147_v5  ;;  %v2608_v5 = vrot.slane %v4153_v18, 9 }
 0x138   : > { %v1318_v39 = vpop.f32.mrf.mxu2  ;;  %2591 = vmatmul.msk.bf16.gmra.mxu1 %vm693_vm4, %v3567_v60  ;;  %v3584_v38 = vadd.f32 %v1606_v11, %v1518_v22  ;;  %v1176_v11 = vrot.slane %v1174_v58, 4  ;;  %v1001_v22 = vadd.f32 %v1000_v46, %v3332_v9 }
 0x139   : > { %v1385_v51 = vadd.f32 %v1318_v39, %v998_v61  ;;  %v1175_v39 = vsel %vm3214_vm7, %v2608_v5, %v1174_v58  ;;  %v3611_v5 = vld [vmem:[%s2884_s29 + $0xc0] sm:$0xf] }
 0x13a   : > { %4148 = vst [vmem:[#allocation38_spill] sm:$0xff] %v3584_v38  ;;  %v1216_v24 = vunpack.c.l.b16 %v1175_v39  ;;  %v4155_v38 = vld [vmem:[#allocation10_spill] sm:$0xff]  ;;  %v1543_v39 = vshrl.u32 %v3611_v5, 16 }
 0x13b   : > { %4156 = vst [vmem:[#allocation5_spill] sm:$0xff] %v3611_v5 }
 0x13c   : > { %v1608_v30 = vpop.f32.mrf.mxu0 }
 0x13d   : > { %v1452_v2 = vpop.f32.mrf.mxu3  ;;  %2624 = vmatmul.msk.bf16.gmra.mxu2 %vm693_vm4, %v3586_v7  ;;  %v1002_v28 = vpop.f32.mrf.mxu1 }
 0x13e   : > { %v1519_v43 = vadd.f32 %v1452_v2, %v1385_v51  ;;  %v1178_v51 = vsel %vm3214_vm7, %v1176_v11, %v1177_v54 }
 0x13f   : > { %v1217_v9 = vunpack.c.l.b16 %v1178_v51 }
 0x140   : > { %v1321_v47 = vpop.f32.mrf.mxu2  ;;  %v3597_v31 = vadd.f32 %v1608_v30, %v1519_v43  ;;  %v1003_v30 = vadd.f32 %v1002_v28, %v3350_v29  ;;  %v1546_v29 = vshll.u32 %v3611_v5, 16 }
 0x141   : > { %v1386_v61 = vadd.f32 %v1321_v47, %v1001_v22  ;;  %v3615_v11 = vpack.c.b16 %v1217_v9, %v1216_v24  ;;  %v3618_v22 = vld [vmem:[%s2884_s29 + $0xc4] sm:$0xf]  ;;  %v4160_v47 = vld [vmem:[#allocation12_spill] sm:$0xff]  ;;  %v4161_v24 = vld [vmem:[#allocation13_spill] sm:$0xff] }
 0x142   : > { %4154 = vst [vmem:[#allocation7_spill] sm:$0xff] %v3597_v31  ;;  %2645 = vmatmul.msk.bf16.gmra.mxu3 %vm693_vm4, %v3593_v34  ;;  %v1552_v28 = vshll.u32 %v3618_v22, 16  ;;  %v1184_v9 = vrot.slane %v4161_v24, 5  ;;  %v1548_v7 = vrot.slane %v1546_v29, 5 }
 0x143   : > { %4158 = vst [vmem:[#allocation41_spill] sm:$0xff] %v3615_v11 }
 0x144   : > { %v1611_v15 = vpop.f32.mrf.mxu0  ;;  %4159 = vst [vmem:[#allocation42_spill] sm:$0xff] %v3618_v22 }
 0x145   : > { %v1455_v18 = vpop.f32.mrf.mxu3  ;;  %v1005_v2 = vpop.f32.mrf.mxu1 }
 0x146   : > { %v1520_v46 = vadd.f32 %v1455_v18, %v1386_v61  ;;  %v1181_v61 = vrot.slane %v4160_v47, 5  ;;  %v1556_v18 = vshrl.u32 %v3618_v22, 16  ;;  %v1006_v5 = vadd.f32 %v1005_v2, %v3370_v48 }
 0x147   : > { %2662 = vmatmul.msk.bf16.gmra.mxu0 %vm693_vm4, %v4155_v38  ;;  %v1545_v38 = vrot.slane %v1543_v39, 4  ;;  %v1554_v22 = vrot.slane %v1552_v28, 5 }
 0x148   : > { %v1323_v43 = vpop.f32.mrf.mxu2  ;;  %2592 = vmatmul.msk.bf16.gmra.mxu1 %vm693_vm4, %v3593_v34  ;;  %v3613_v58 = vadd.f32 %v1611_v15, %v1520_v46  ;;  %v1558_v60 = vrot.slane %v1556_v18, 4 }
 0x149   : > { %v1387_v54 = vadd.f32 %v1323_v43, %v1003_v30  ;;  %v3629_v30 = vld [vmem:[%s2884_s29 + $0xb4] sm:$0xff]  ;;  %v4162_v43 = vld [vmem:[#allocation11_spill] sm:$0xff]  ;;  %v1549_v2 = vor.u32 %v1548_v7, %v1545_v38 }
 0x14a   : > { %4157 = vst [vmem:[#allocation40_spill] sm:$0xff] %v3613_v58  ;;  %v2609_v47 = vrot.slane %v4162_v43, 9  ;;  %v1183_v58 = vrot.slane %v1181_v61, 4  ;;  %v1559_v39 = vor.u32 %v1558_v60, %v1554_v22 }
 0x14c   : > { %v1613_v51 = vpop.f32.mrf.mxu0  ;;  %v1560_v38 = vrot.slane %v1559_v39, 4 }
 0x14d   : > { %v1457_v31 = vpop.f32.mrf.mxu3  ;;  %2625 = vmatmul.msk.bf16.gmra.mxu2 %vm693_vm4, %v3615_v11  ;;  %v1007_v15 = vpop.f32.mrf.mxu1  ;;  %v3636_v11 = vld [vmem:[%s2884_s29 + $0xc8] sm:$0x1] }
 0x14e   : > { %v1521_v46 = vadd.f32 %v1457_v31, %v1387_v54  ;;  %v1182_v31 = vsel %vm3214_vm7, %v2609_v47, %v1181_v61  ;;  %v1185_v54 = vsel %vm3214_vm7, %v1183_v58, %v1184_v9  ;;  %v1562_v29 = vshll.u32 %v3636_v11, 16 }
 0x14f   : > { %v1218_v18 = vunpack.c.l.b16 %v1182_v31  ;;  %v1008_v24 = vadd.f32 %v1007_v15, %v3391_v63  ;;  %v1550_v58 = vrot.slane %v1549_v2, 4 }
 0x150   : > { %v1326_v34 = vpop.f32.mrf.mxu2  ;;  %v3633_v49 = vadd.f32 %v1613_v51, %v1521_v46  ;;  %v1564_v60 = vrot.slane %v1562_v29, 5 }
 0x151   : > { %v1388_v17 = vadd.f32 %v1326_v34, %v1006_v5  ;;  %v1219_v34 = vunpack.c.l.b16 %v1185_v54  ;;  %v3661_v54 = vld [vmem:[%s2884_s29 + $0xc0] sm:$0xff] }
 0x152   : > { %2646 = vmatmul.msk.bf16.gmra.mxu3 %vm693_vm4, %v3629_v30  ;;  %v1565_v63 = vsel %vm2911_vm3, %v1560_v38, %v1564_v60 }
 0x153   : > { %v3652_v46 = vpack.c.b16 %v1219_v34, %v1218_v18  ;;  %v1569_v39 = vunpack.c.l.b16 %v1565_v63 }
 0x154   : > { %v1616_v48 = vpop.f32.mrf.mxu0 }
 0x155   : > { %v1460_v28 = vpop.f32.mrf.mxu3  ;;  %v1010_v51 = vpop.f32.mrf.mxu1 }
 0x156   : > { %v1522_v5 = vadd.f32 %v1460_v28, %v1388_v17  ;;  %v1555_v17 = vsel %vm2911_vm3, %v1550_v58, %v1554_v22 }
 0x157   : > { %2663 = vmatmul.msk.bf16.gmra.mxu0 %vm693_vm4, %v3223_v53  ;;  %v1568_v2 = vunpack.c.l.b16 %v1555_v17 }
 0x158   : > { %v1328_v61 = vpop.f32.mrf.mxu2  ;;  %2593 = vmatmul.msk.bf16.gmra.mxu1 %vm693_vm4, %v3629_v30  ;;  %v3650_v7 = vadd.f32 %v1616_v48, %v1522_v5  ;;  %v1011_v48 = vadd.f32 %v1010_v51, %v3412_v26 }
 0x159   : > { %v1389_v9 = vadd.f32 %v1328_v61, %v1008_v24  ;;  %v3668_v22 = vpack.c.b16 %v1569_v39, %v1568_v2 }
 0x15c   : > { %v1618_v43 = vpop.f32.mrf.mxu0 }
 0x15d   : > { %v1462_v15 = vpop.f32.mrf.mxu3  ;;  %2626 = vmatmul.msk.bf16.gmra.mxu2 %vm693_vm4, %v3652_v46  ;;  %v1012_v47 = vpop.f32.mrf.mxu1 }
 0x15e   : > { %v1523_v31 = vadd.f32 %v1462_v15, %v1389_v9  ;;  %v1013_v26 = vadd.f32 %v1012_v47, %v3429_v0 }
 0x160   : > { %v1331_v29 = vpop.f32.mrf.mxu2  ;;  %v3664_v28 = vadd.f32 %v1618_v43, %v1523_v31 }
 0x161   : > { %v1390_v18 = vadd.f32 %v1331_v29, %v1011_v48 }
 0x162   : > { %2647 = vmatmul.msk.bf16.gmra.mxu3 %vm693_vm4, %v3661_v54 }
 0x164   : > { %v1621_v34 = vpop.f32.mrf.mxu0 }
 0x165   : > { %v1465_v5 = vpop.f32.mrf.mxu3  ;;  %v1015_v24 = vpop.f32.mrf.mxu1 }
 0x166   : > { %v1524_v61 = vadd.f32 %v1465_v5, %v1390_v18  ;;  %v1016_v63 = vadd.f32 %v1015_v24, %v3314_v16 }
 0x167   : > { %2664 = vmatmul.msk.bf16.gmra.mxu0 %vm693_vm4, %v3668_v22 }
 0x168   : > { %v1333_v51 = vpop.f32.mrf.mxu2  ;;  %2667 = vmatmul.msk.bf16.vlgmr.msra.gmra.mxu1 %vm693_vm4, %v3248_v55  ;;  %v3675_v58 = vadd.f32 %v1621_v34, %v1524_v61 }
 0x169   : > { %v1391_v38 = vadd.f32 %v1333_v51, %v1013_v26 }
 0x16c   : > { %v1623_v60 = vpop.f32.mrf.mxu0 }
 0x16d   : > { %v1467_v9 = vpop.f32.mrf.mxu3  ;;  %2688 = vmatmul.msk.bf16.vlgmr.msra.gmra.mxu2 %vm693_vm4, %v3260_v6  ;;  %v1017_v43 = vpop.f32.mrf.mxu1 }
 0x16e   : > { %v1525_v17 = vadd.f32 %v1467_v9, %v1391_v38  ;;  %v1018_v6 = vadd.f32 %v1017_v43, %v3336_v57 }
 0x170   : > { %v1336_v15 = vpop.f32.mrf.mxu2  ;;  %v3680_v31 = vadd.f32 %v1623_v60, %v1525_v17 }
 0x171   : > { %v1392_v0 = vadd.f32 %v1336_v15, %v1016_v63 }
 0x172   : > { %2705 = vmatmul.msk.bf16.vlgmr.msra.gmra.mxu3 %vm693_vm4, %v3151_v45 }
 0x174   : > { %v1626_v55 = vpop.f32.mrf.mxu0 }
 0x175   : > { %v1470_v47 = vpop.f32.mrf.mxu3  ;;  %v1020_v48 = vpop.f32.mrf.mxu1 }
 0x176   : > { %v1526_v2 = vadd.f32 %v1470_v47, %v1392_v0  ;;  %v1021_v24 = vadd.f32 %v1020_v48, %v3356_v59 }
 0x177   : > { %2723 = vmatmul.msk.bf16.vlgmr.msra.gmra.mxu0 %vm693_vm4, %v3274_v52 }
 0x178   : > { %v1338_v39 = vpop.f32.mrf.mxu2  ;;  %2668 = vmatmul.msk.bf16.gmra.mxu1 %vm693_vm4, %v3274_v52  ;;  %v3689_v16 = vadd.f32 %v1626_v55, %v1526_v2 }
 0x179   : > { %v1393_v29 = vadd.f32 %v1338_v39, %v1018_v6 }
 0x17c   : > { %v1628_v18 = vpop.f32.mrf.mxu0 }
 0x17d   : > { %v1472_v34 = vpop.f32.mrf.mxu3  ;;  %2689 = vmatmul.msk.bf16.gmra.mxu2 %vm693_vm4, %v3280_v41  ;;  %v1022_v45 = vpop.f32.mrf.mxu1 }
 0x17e   : > { %v1527_v5 = vadd.f32 %v1472_v34, %v1393_v29  ;;  %v1023_v41 = vadd.f32 %v1022_v45, %v3374_v3 }
 0x180   : > { %v1341_v61 = vpop.f32.mrf.mxu2  ;;  %v3694_v26 = vadd.f32 %v1628_v18, %v1527_v5 }
 0x181   : > { %v1394_v57 = vadd.f32 %v1341_v61, %v1021_v24 }
 0x182   : > { %2706 = vmatmul.msk.bf16.gmra.mxu3 %vm693_vm4, %v3241_v20 }
 0x184   : > { %v1631_v52 = vpop.f32.mrf.mxu0 }
 0x185   : > { %v1475_v51 = vpop.f32.mrf.mxu3  ;;  %v1025_v38 = vpop.f32.mrf.mxu1 }
 0x186   : > { %v1528_v60 = vadd.f32 %v1475_v51, %v1394_v57  ;;  %v1026_v0 = vadd.f32 %v1025_v38, %v3393_v23 }
 0x187   : > { %2724 = vmatmul.msk.bf16.gmra.mxu0 %vm693_vm4, %v3294_v40 }
 0x188   : > { %v1343_v9 = vpop.f32.mrf.mxu2  ;;  %2669 = vmatmul.msk.bf16.gmra.mxu1 %vm693_vm4, %v3294_v40  ;;  %v3703_v59 = vadd.f32 %v1631_v52, %v1528_v60 }
 0x189   : > { %v1395_v43 = vadd.f32 %v1343_v9, %v1023_v41 }
 0x18c   : > { %v1633_v17 = vpop.f32.mrf.mxu0 }
 0x18d   : > { %v1477_v63 = vpop.f32.mrf.mxu3  ;;  %2690 = vmatmul.msk.bf16.gmra.mxu2 %vm693_vm4, %v3302_v8  ;;  %v1027_v20 = vpop.f32.mrf.mxu1 }
 0x18e   : > { %v1529_v15 = vadd.f32 %v1477_v63, %v1395_v43  ;;  %v1028_v8 = vadd.f32 %v1027_v20, %v3414_v1  ;;  %v4163_v43 = vld [vmem:[#allocation18_spill] sm:$0xff]  ;;  %v4164_v63 = vld [vmem:[#allocation16_spill] sm:$0xff] }
 0x190   : > { %v1346_v55 = vpop.f32.mrf.mxu2  ;;  %v3708_v47 = vadd.f32 %v1633_v17, %v1529_v15 }
 0x191   : > { %v1396_v3 = vadd.f32 %v1346_v55, %v1026_v0  ;;  %v4165_v55 = vld [vmem:[#allocation8_spill] sm:$0xff] }
 0x192   : > { %2707 = vmatmul.msk.bf16.gmra.mxu3 %vm693_vm4, %v2923_v62 }
 0x194   : > { %v1636_v40 = vpop.f32.mrf.mxu0 }
 0x195   : > { %v1480_v48 = vpop.f32.mrf.mxu3  ;;  %v1030_v2 = vpop.f32.mrf.mxu1 }
 0x196   : > { %v1530_v6 = vadd.f32 %v1480_v48, %v1396_v3  ;;  %v1031_v5 = vadd.f32 %v1030_v2, %v3436_v56  ;;  %v4166_v2 = vld [vmem:[#allocation21_spill] sm:$0xff] }
 0x197   : > { %2725 = vmatmul.msk.bf16.gmra.mxu0 %vm693_vm4, %v3322_v12 }
 0x198   : > { %v1348_v39 = vpop.f32.mrf.mxu2  ;;  %2670 = vmatmul.msk.bf16.gmra.mxu1 %vm693_vm4, %v3322_v12  ;;  %v3717_v23 = vadd.f32 %v1636_v40, %v1530_v6  ;;  %v4167_v6 = vld [vmem:[#allocation17_spill] sm:$0xff] }
 0x199   : > { %v1397_v29 = vadd.f32 %v1348_v39, %v1028_v8 }
 0x19c   : > { %v1638_v18 = vpop.f32.mrf.mxu0 }
 0x19d   : > { %v1482_v34 = vpop.f32.mrf.mxu3  ;;  %2691 = vmatmul.msk.bf16.gmra.mxu2 %vm693_vm4, %v3330_v27  ;;  %v1032_v62 = vpop.f32.mrf.mxu1 }
 0x19e   : > { %v1531_v45 = vadd.f32 %v1482_v34, %v1397_v29  ;;  %v1033_v27 = vadd.f32 %v1032_v62, %v3451_v44 }
 0x1a0   : > { %v1351_v24 = vpop.f32.mrf.mxu2  ;;  %v3722_v61 = vadd.f32 %v1638_v18, %v1531_v45  ;;  %v4168_v45 = vld [vmem:[#allocation22_spill] sm:$0xff] }
 0x1a1   : > { %v1398_v1 = vadd.f32 %v1351_v24, %v1031_v5 }
 0x1a2   : > { %2708 = vmatmul.msk.bf16.gmra.mxu3 %vm693_vm4, %v2997_v37 }
 0x1a4   : > { %v1641_v12 = vpop.f32.mrf.mxu0 }
 0x1a5   : > { %v1485_v57 = vpop.f32.mrf.mxu3  ;;  %v1035_v52 = vpop.f32.mrf.mxu1 }
 0x1a6   : > { %v1532_v51 = vadd.f32 %v1485_v57, %v1398_v1  ;;  %v1036_v20 = vadd.f32 %v1035_v52, %v4164_v63  ;;  %v4169_v1 = vld [vmem:[#allocation19_spill] sm:$0xff] }
 0x1a7   : > { %2726 = vmatmul.msk.bf16.gmra.mxu0 %vm693_vm4, %v3354_v33 }
 0x1a8   : > { %v1353_v38 = vpop.f32.mrf.mxu2  ;;  %2671 = vmatmul.msk.bf16.gmra.mxu1 %vm693_vm4, %v3354_v33  ;;  %v3731_v56 = vadd.f32 %v1641_v12, %v1532_v51 }
 0x1a9   : > { %v1399_v60 = vadd.f32 %v1353_v38, %v1033_v27  ;;  %v4170_v27 = vld [vmem:[#allocation14_spill] sm:$0xff] }
 0x1ac   : > { %v1643_v41 = vpop.f32.mrf.mxu0 }
 0x1ad   : > { %v1487_v9 = vpop.f32.mrf.mxu3  ;;  %2692 = vmatmul.msk.bf16.gmra.mxu2 %vm693_vm4, %v4163_v43  ;;  %v1037_v37 = vpop.f32.mrf.mxu1  ;;  %v4171_v43 = vld [vmem:[#allocation24_spill] sm:$0xff] }
 0x1ae   : > { %v1533_v17 = vadd.f32 %v1487_v9, %v1399_v60  ;;  %v1038_v8 = vadd.f32 %v1037_v37, %v4167_v6  ;;  %v4172_v37 = vld [vmem:[#allocation20_spill] sm:$0xff] }
 0x1b0   : > { %v1356_v15 = vpop.f32.mrf.mxu2  ;;  %v3736_v0 = vadd.f32 %v1643_v41, %v1533_v17 }
 0x1b1   : > { %v1400_v44 = vadd.f32 %v1356_v15, %v1036_v20 }
 0x1b2   : > { %2709 = vmatmul.msk.bf16.gmra.mxu3 %vm693_vm4, %v4165_v55 }
 0x1b4   : > { %v1646_v33 = vpop.f32.mrf.mxu0 }
 0x1b5   : > { %v1490_v3 = vpop.f32.mrf.mxu3  ;;  %v1040_v40 = vpop.f32.mrf.mxu1 }
 0x1b6   : > { %v1534_v48 = vadd.f32 %v1490_v3, %v1400_v44  ;;  %v1041_v12 = vadd.f32 %v1040_v40, %v4169_v1  ;;  %v4177_v1 = vld [vmem:[#allocation25_spill] sm:$0xff] }
 0x1b7   : > { %2727 = vmatmul.msk.bf16.gmra.mxu0 %vm693_vm4, %v4166_v2 }
 0x1b8   : > { %v1358_v39 = vpop.f32.mrf.mxu2  ;;  %2672 = vmatmul.msk.bf16.gmra.mxu1 %vm693_vm4, %v4166_v2  ;;  %v3745_v29 = vadd.f32 %v1646_v33, %v1534_v48  ;;  %v4173_v33 = vld [vmem:[#allocation26_spill] sm:$0xff]  ;;  %v4174_v48 = vld [vmem:[#allocation23_spill] sm:$0xff] }
 0x1b9   : > { %v1401_v18 = vadd.f32 %v1358_v39, %v1038_v8 }
 0x1bc   : > { %v1648_v34 = vpop.f32.mrf.mxu0 }
 0x1bd   : > { %v1492_v62 = vpop.f32.mrf.mxu3  ;;  %2693 = vmatmul.msk.bf16.gmra.mxu2 %vm693_vm4, %v4168_v45  ;;  %v1042_v5 = vpop.f32.mrf.mxu1 }
 0x1be   : > { %v1535_v24 = vadd.f32 %v1492_v62, %v1401_v18  ;;  %v1043_v17 = vadd.f32 %v1042_v5, %v4172_v37  ;;  %v4175_v18 = vld [vmem:[#allocation2_spill] sm:$0xff] }
 0x1c0   : > { %v1361_v57 = vpop.f32.mrf.mxu2  ;;  %v3750_v52 = vadd.f32 %v1648_v34, %v1535_v24  ;;  %v4176_v24 = vld [vmem:[#allocation28_spill] sm:$0xff] }
 0x1c1   : > { %v1402_v51 = vadd.f32 %v1361_v57, %v1041_v12 }
 0x1c2   : > { %2710 = vmatmul.msk.bf16.gmra.mxu3 %vm693_vm4, %v4170_v27 }
 0x1c4   : > { %v1651_v38 = vpop.f32.mrf.mxu0 }
 0x1c5   : > { %v1495_v60 = vpop.f32.mrf.mxu3  ;;  %v1045_v41 = vpop.f32.mrf.mxu1 }
 0x1c6   : > { %v1536_v9 = vadd.f32 %v1495_v60, %v1402_v51  ;;  %v1046_v2 = vadd.f32 %v1045_v41, %v4174_v48 }
 0x1c7   : > { %2728 = vmatmul.msk.bf16.gmra.mxu0 %vm693_vm4, %v4171_v43 }
 0x1c8   : > { %v1363_v63 = vpop.f32.mrf.mxu2  ;;  %2673 = vmatmul.msk.bf16.gmra.mxu1 %vm693_vm4, %v4171_v43  ;;  %v3759_v20 = vadd.f32 %v1651_v38, %v1536_v9  ;;  %v4178_v43 = vld [vmem:[#allocation27_spill] sm:$0xff] }
 0x1c9   : > { %v1403_v15 = vadd.f32 %v1363_v63, %v1043_v17 }
 0x1cc   : > { %v1653_v44 = vpop.f32.mrf.mxu0 }
 0x1cd   : > { %v1497_v55 = vpop.f32.mrf.mxu3  ;;  %2694 = vmatmul.msk.bf16.gmra.mxu2 %vm693_vm4, %v4173_v33  ;;  %v1047_v3 = vpop.f32.mrf.mxu1 }
 0x1ce   : > { %v1537_v40 = vadd.f32 %v1497_v55, %v1403_v15  ;;  %v1048_v12 = vadd.f32 %v1047_v3, %v4177_v1 }
 0x1d0   : > { %v1366_v6 = vpop.f32.mrf.mxu2  ;;  %v3764_v8 = vadd.f32 %v1653_v44, %v1537_v40  ;;  %v4179_v40 = vld [vmem:[#allocation29_spill] sm:$0xff] }
 0x1d1   : > { %v1404_v39 = vadd.f32 %v1366_v6, %v1046_v2 }
 0x1d2   : > { %2711 = vmatmul.msk.bf16.gmra.mxu3 %vm693_vm4, %v4175_v18 }
 0x1d4   : > { %v1656_v34 = vpop.f32.mrf.mxu0 }
 0x1d5   : > { %v1500_v62 = vpop.f32.mrf.mxu3  ;;  %v1050_v45 = vpop.f32.mrf.mxu1 }
 0x1d6   : > { %v1538_v5 = vadd.f32 %v1500_v62, %v1404_v39  ;;  %v1051_v37 = vadd.f32 %v1050_v45, %v4178_v43 }
 0x1d7   : > { %2729 = vmatmul.msk.bf16.gmra.mxu0 %vm693_vm4, %v4176_v24 }
 0x1d8   : > { %v1368_v57 = vpop.f32.mrf.mxu2  ;;  %2674 = vmatmul.msk.bf16.gmra.mxu1 %vm693_vm4, %v4176_v24  ;;  %v3773_v51 = vadd.f32 %v1656_v34, %v1538_v5  ;;  %v2268_v24 = vld [vmem:[%s4061_s2] sm:$0x3] }
 0x1d9   : > { %v1405_v27 = vadd.f32 %v1368_v57, %v1048_v12 }
 0x1dc   : > { %v1658_v38 = vpop.f32.mrf.mxu0 }
 0x1dd   : > { %v1502_v60 = vpop.f32.mrf.mxu3  ;;  %2695 = vmatmul.msk.bf16.gmra.mxu2 %vm693_vm4, %v3466_v19  ;;  %v1052_v41 = vpop.f32.mrf.mxu1 }
 0x1de   : > { %v1539_v9 = vadd.f32 %v1502_v60, %v1405_v27  ;;  %v1053_v19 = vadd.f32 %v1052_v41, %v4179_v40  ;;  %v3799_v27 = vperm.slane %v2268_v24, 0  ;;  %v4180_v40 = vld [vmem:[#allocation15_spill] sm:$0xff] }
 0x1e0   : > { %v1371_v17 = vpop.f32.mrf.mxu2  ;;  %v3778_v63 = vadd.f32 %v1658_v38, %v1539_v9  ;;  %v3803_v38 = vperm.slane %v2268_v24, 1 }
 0x1e1   : > { %v1406_v15 = vadd.f32 %v1371_v17, %v1051_v37 }
 0x1e2   : > { %2712 = vmatmul.msk.bf16.gmra.mxu3 %vm693_vm4, %v3022_v4 }
 0x1e4   : > { %v1661_v44 = vpop.f32.mrf.mxu0 }
 0x1e5   : > { %v1505_v55 = vpop.f32.mrf.mxu3  ;;  %v1726_v33 = vpop.f32.mrf.mxu1 }
 0x1e6   : > { %v1540_v3 = vadd.f32 %v1505_v55, %v1406_v15  ;;  %v1806_v62 = vadd.f32 %v1726_v33, %v3481_v32 }
 0x1e7   : > { %2730 = vmatmul.msk.bf16.gmra.mxu0 %vm693_vm4, %v3483_v10 }
 0x1e8   : > { %v1373_v48 = vpop.f32.mrf.mxu2  ;;  %2675 = vmatmul.msk.bf16.gmra.mxu1 %vm693_vm4, %v3483_v10  ;;  %v3787_v2 = vadd.f32 %v1661_v44, %v1540_v3 }
 0x1e9   : > { %v1407_v6 = vadd.f32 %v1373_v48, %v1053_v19 }
 0x1ec   : > { %v1663_v39 = vpop.f32.mrf.mxu0 }
 0x1ed   : > { %v1507_v18 = vpop.f32.mrf.mxu3  ;;  %2696 = vmatmul.msk.bf16.gmra.mxu2 %vm693_vm4, %v3490_v42  ;;  %v1728_v4 = vpop.f32.mrf.mxu1 }
 0x1ee   : > { %v1541_v34 = vadd.f32 %v1507_v18, %v1407_v6  ;;  %v1807_v60 = vadd.f32 %v1728_v4, %v3494_v35 }
 0x1f0   : > { %v1860_v45 = vpop.f32.mrf.mxu2  ;;  %v3792_v5 = vadd.f32 %v1663_v39, %v1541_v34  ;;  %v4181_v34 = vld [vmem:[#allocation31_spill] sm:$0xff] }
 0x1f1   : > { %v1940_v10 = vadd.f32 %v1860_v45, %v1806_v62  ;;  %v4182_v62 = vld [vmem:[#allocation9_spill] sm:$0xff] }
 0x1f2   : > { %2713 = vmatmul.msk.bf16.gmra.mxu3 %vm693_vm4, %v3107_v25 }
 0x1f4   : > { %v2156_v1 = vpop.f32.mrf.mxu0 }
 0x1f5   : > { %v2016_v12 = vpop.f32.mrf.mxu3  ;;  %v1731_v57 = vpop.f32.mrf.mxu1 }
 0x1f6   : > { %v2096_v42 = vadd.f32 %v2016_v12, %v1940_v10  ;;  %v1808_v55 = vadd.f32 %v1731_v57, %v3507_v21 }
 0x1f7   : > { %2731 = vmatmul.msk.bf16.gmra.mxu0 %vm693_vm4, %v3509_v13 }
 0x1f8   : > { %v2236_v32 = vadd.f32 %v2156_v1, %v2096_v42  ;;  %v1862_v25 = vpop.f32.mrf.mxu2  ;;  %2676 = vmatmul.msk.bf16.gmra.mxu1 %vm693_vm4, %v3509_v13 }
 0x1f9   : > { %v1941_v9 = vadd.f32 %v1862_v25, %v1807_v60 }
 0x1fa   : > { %v2270_v41 = vmul.f32 %v3799_v27, %v2236_v32  ;;  %v4183_v32 = vld [vmem:[#allocation32_spill] sm:$0xff] }
 0x1fc   : > { %v2303_v43 = vadd.f32 %v3803_v38, %v2270_v41  ;;  %v2158_v37 = vpop.f32.mrf.mxu0 }
 0x1fd   : > { %v2018_v17 = vpop.f32.mrf.mxu3  ;;  %2697 = vmatmul.msk.bf16.gmra.mxu2 %vm693_vm4, %v3516_v50  ;;  %v1733_v35 = vpop.f32.mrf.mxu1 }
 0x1fe   : > { %v2335_v13 = vmax.f32 %v2303_v43, 0.0  ;;  %v2097_v15 = vadd.f32 %v2018_v17, %v1941_v9  ;;  %v1809_v45 = vadd.f32 %v1733_v35, %v4182_v62  ;;  %v4184_v43 = vld [vmem:[#allocation30_spill] sm:$0xff] }
 0x200   : > { %2368 = vst.msk [vmem:[%s3814_s20] sm:$0xff] %vm2367_vm8, %v2335_v13  ;;  %v2237_v44 = vadd.f32 %v2158_v37, %v2097_v15  ;;  %v1865_v33 = vpop.f32.mrf.mxu2  ;;  %v4185_v13 = vld [vmem:[#allocation3_spill] sm:$0xff] }
 0x201   : > { %v1942_v19 = vadd.f32 %v1865_v33, %v1808_v55 }
 0x202   : > { %v2271_v3 = vmul.f32 %v3799_v27, %v2237_v44  ;;  %2714 = vmatmul.msk.bf16.gmra.mxu3 %vm693_vm4, %v4180_v40 }
 0x204   : > { %v2304_v48 = vadd.f32 %v3803_v38, %v2271_v3  ;;  %v2161_v6 = vpop.f32.mrf.mxu0 }
 0x205   : > { %v2021_v50 = vpop.f32.mrf.mxu3  ;;  %v1736_v39 = vpop.f32.mrf.mxu1 }
 0x206   : > { %v2336_v18 = vmax.f32 %v2304_v48, 0.0  ;;  %v2098_v4 = vadd.f32 %v2021_v50, %v1942_v19  ;;  %v1810_v37 = vadd.f32 %v1736_v39, %v4184_v43  ;;  %v4186_v48 = vld [vmem:[#allocation35_spill] sm:$0xff]  ;;  %v4187_v50 = vld [vmem:[#allocation33_spill] sm:$0xff] }
 0x207   : > { %2732 = vmatmul.msk.bf16.gmra.mxu0 %vm693_vm4, %v4181_v34 }
 0x208   : > { %2369 = vst.msk [vmem:[%s3814_s20 + $0x8] sm:$0xff] %vm2367_vm8, %v2336_v18  ;;  %v2238_v21 = vadd.f32 %v2161_v6, %v2098_v4  ;;  %v1867_v10 = vpop.f32.mrf.mxu2  ;;  %2677 = vmatmul.msk.bf16.gmra.mxu1 %vm693_vm4, %v4181_v34 }
 0x209   : > { %v1943_v1 = vadd.f32 %v1867_v10, %v1809_v45  ;;  %v4188_v10 = vld [vmem:[#allocation36_spill] sm:$0xff] }
 0x20a   : > { %v2272_v24 = vmul.f32 %v3799_v27, %v2238_v21 }
 0x20c   : > { %v2305_v12 = vadd.f32 %v3803_v38, %v2272_v24  ;;  %v2163_v57 = vpop.f32.mrf.mxu0 }
 0x20d   : > { %v2023_v42 = vpop.f32.mrf.mxu3  ;;  %2698 = vmatmul.msk.bf16.gmra.mxu2 %vm693_vm4, %v4183_v32  ;;  %v1738_v60 = vpop.f32.mrf.mxu1 }
 0x20e   : > { %v2337_v25 = vmax.f32 %v2305_v12, 0.0  ;;  %v2099_v41 = vadd.f32 %v2023_v42, %v1943_v1  ;;  %v1811_v39 = vadd.f32 %v1738_v60, %v4187_v50  ;;  %v4189_v42 = vld [vmem:[#allocation34_spill] sm:$0xff] }
 0x210   : > { %2370 = vst.msk [vmem:[%s3814_s20 + $0x10] sm:$0xff] %vm2367_vm8, %v2337_v25  ;;  %v2239_v9 = vadd.f32 %v2163_v57, %v2099_v41  ;;  %v1870_v17 = vpop.f32.mrf.mxu2  ;;  %v4190_v41 = vld [vmem:[#allocation4_spill] sm:$0xff] }
 0x211   : > { %v1944_v15 = vadd.f32 %v1870_v17, %v1810_v37 }
 0x212   : > { %v2273_v35 = vmul.f32 %v3799_v27, %v2239_v9  ;;  %2715 = vmatmul.msk.bf16.gmra.mxu3 %vm693_vm4, %v4185_v13 }
 0x214   : > { %v2306_v44 = vadd.f32 %v3803_v38, %v2273_v35  ;;  %v2166_v55 = vpop.f32.mrf.mxu0 }
 0x215   : > { %v2026_v33 = vpop.f32.mrf.mxu3  ;;  %v1741_v3 = vpop.f32.mrf.mxu1 }
 0x216   : > { %v2338_v40 = vmax.f32 %v2306_v44, 0.0  ;;  %v2100_v19 = vadd.f32 %v2026_v33, %v1944_v15  ;;  %v1812_v32 = vadd.f32 %v1741_v3, %v4189_v42  ;;  %v4191_v44 = vld [vmem:[#allocation39_spill] sm:$0xff]  ;;  %v4192_v33 = vld [vmem:[#allocation37_spill] sm:$0xff] }
 0x217   : > { %2733 = vmatmul.msk.bf16.gmra.mxu0 %vm693_vm4, %v4186_v48 }
 0x218   : > { %2371 = vst.msk [vmem:[%s3814_s20 + $0x18] sm:$0xff] %vm2367_vm8, %v2338_v40  ;;  %v2240_v6 = vadd.f32 %v2166_v55, %v2100_v19  ;;  %v1872_v18 = vpop.f32.mrf.mxu2  ;;  %2678 = vmatmul.msk.bf16.gmra.mxu1 %vm693_vm4, %v4186_v48 }
 0x219   : > { %v1945_v34 = vadd.f32 %v1872_v18, %v1811_v39  ;;  %v4193_v18 = vld [vmem:[#allocation6_spill] sm:$0xff] }
 0x21a   : > { %v2274_v4 = vmul.f32 %v3799_v27, %v2240_v6 }
 0x21c   : > { %v2307_v21 = vadd.f32 %v3803_v38, %v2274_v4  ;;  %v2168_v62 = vpop.f32.mrf.mxu0 }
 0x21d   : > { %v2028_v45 = vpop.f32.mrf.mxu3  ;;  %2699 = vmatmul.msk.bf16.gmra.mxu2 %vm693_vm4, %v4188_v10  ;;  %v1743_v24 = vpop.f32.mrf.mxu1 }
 0x21e   : > { %v2339_v1 = vmax.f32 %v2307_v21, 0.0  ;;  %v2101_v12 = vadd.f32 %v2028_v45, %v1945_v34  ;;  %v1813_v3 = vadd.f32 %v1743_v24, %v4192_v33  ;;  %v4194_v45 = vld [vmem:[#allocation38_spill] sm:$0xff] }
 0x220   : > { %2372 = vst.msk [vmem:[%s3814_s20 + $0x20] sm:$0xff] %vm2367_vm8, %v2339_v1  ;;  %v2241_v57 = vadd.f32 %v2168_v62, %v2101_v12  ;;  %v1875_v60 = vpop.f32.mrf.mxu2  ;;  %v4195_v12 = vld [vmem:[#allocation10_spill] sm:$0xff] }
 0x221   : > { %v1946_v9 = vadd.f32 %v1875_v60, %v1812_v32 }
 0x222   : > { %v2275_v25 = vmul.f32 %v3799_v27, %v2241_v57  ;;  %2716 = vmatmul.msk.bf16.gmra.mxu3 %vm693_vm4, %v4190_v41 }
 0x224   : > { %v2308_v43 = vadd.f32 %v3803_v38, %v2275_v25  ;;  %v2171_v37 = vpop.f32.mrf.mxu0 }
 0x225   : > { %v2031_v17 = vpop.f32.mrf.mxu3  ;;  %v1746_v35 = vpop.f32.mrf.mxu1 }
 0x226   : > { %v2340_v13 = vmax.f32 %v2308_v43, 0.0  ;;  %v2102_v15 = vadd.f32 %v2031_v17, %v1946_v9  ;;  %v1814_v10 = vadd.f32 %v1746_v35, %v4194_v45  ;;  %v4196_v43 = vld [vmem:[#allocation41_spill] sm:$0xff]  ;;  %v4197_v17 = vld [vmem:[#allocation7_spill] sm:$0xff] }
 0x227   : > { %2734 = vmatmul.msk.bf16.gmra.mxu0 %vm693_vm4, %v4191_v44 }
 0x228   : > { %2373 = vst.msk [vmem:[%s3814_s20 + $0x28] sm:$0xff] %vm2367_vm8, %v2340_v13  ;;  %v2242_v55 = vadd.f32 %v2171_v37, %v2102_v15  ;;  %v1877_v40 = vpop.f32.mrf.mxu2  ;;  %2679 = vmatmul.msk.bf16.gmra.mxu1 %vm693_vm4, %v4191_v44 }
 0x229   : > { %v1947_v48 = vadd.f32 %v1877_v40, %v1813_v3 }
 0x22a   : > { %v2276_v19 = vmul.f32 %v3799_v27, %v2242_v55 }
 0x22c   : > { %v2309_v6 = vadd.f32 %v3803_v38, %v2276_v19  ;;  %v2173_v50 = vpop.f32.mrf.mxu0 }
 0x22d   : > { %v2033_v39 = vpop.f32.mrf.mxu3  ;;  %2700 = vmatmul.msk.bf16.gmra.mxu2 %vm693_vm4, %v4193_v18  ;;  %v1748_v4 = vpop.f32.mrf.mxu1 }
 0x22e   : > { %v2341_v34 = vmax.f32 %v2309_v6, 0.0  ;;  %v2103_v21 = vadd.f32 %v2033_v39, %v1947_v48  ;;  %v1815_v35 = vadd.f32 %v1748_v4, %v4197_v17 }
 0x230   : > { %2374 = vst.msk [vmem:[%s3814_s20 + $0x30] sm:$0xff] %vm2367_vm8, %v2341_v34  ;;  %v2243_v62 = vadd.f32 %v2173_v50, %v2103_v21  ;;  %v1880_v24 = vpop.f32.mrf.mxu2  ;;  %v4198_v50 = vld [vmem:[#allocation40_spill] sm:$0xff] }
 0x231   : > { %v1948_v57 = vadd.f32 %v1880_v24, %v1814_v10  ;;  %v3899_v10 = vld [vmem:[%s2884_s29 + $0xcc] sm:$0xf]  ;;  %v3902_v24 = vld [vmem:[%s2884_s29 + $0xd0] sm:$0xf] }
 0x232   : > { %v2277_v1 = vmul.f32 %v3799_v27, %v2243_v62  ;;  %2717 = vmatmul.msk.bf16.gmra.mxu3 %vm693_vm4, %v4195_v12 }
 0x234   : > { %v2310_v42 = vadd.f32 %v3803_v38, %v2277_v1  ;;  %v2176_v32 = vpop.f32.mrf.mxu0 }
 0x235   : > { %v2036_v60 = vpop.f32.mrf.mxu3  ;;  %v1751_v25 = vpop.f32.mrf.mxu1 }
 0x236   : > { %v2342_v41 = vmax.f32 %v2310_v42, 0.0  ;;  %v2104_v9 = vadd.f32 %v2036_v60, %v1948_v57  ;;  %v1816_v39 = vadd.f32 %v1751_v25, %v4198_v50  ;;  %v1976_v25 = vshll.u32 %v3899_v10, 16 }
 0x237   : > { %2735 = vmatmul.msk.bf16.gmra.mxu0 %vm693_vm4, %v4196_v43 }
 0x238   : > { %2375 = vst.msk [vmem:[%s3814_s20 + $0x38] sm:$0xff] %vm2367_vm8, %v2342_v41  ;;  %v2244_v37 = vadd.f32 %v2176_v32, %v2104_v9  ;;  %v1882_v13 = vpop.f32.mrf.mxu2  ;;  %2680 = vmatmul.msk.bf16.gmra.mxu1 %vm693_vm4, %v4196_v43  ;;  %v4200_v32 = vld [vmem:[#allocation5_spill] sm:$0xff]  ;;  %v1982_v41 = vshll.u32 %v3902_v24, 16  ;;  %v1986_v9 = vshrl.u32 %v3902_v24, 16 }
 0x239   : > { %v1949_v44 = vadd.f32 %v1882_v13, %v1815_v35  ;;  %v2665_v60 = vrot.slane %v4200_v32, 9  ;;  %v1704_v13 = vrot.slane %v3636_v11, 5 }
 0x23a   : > { %v2278_v15 = vmul.f32 %v3799_v27, %v2244_v37 }
 0x23c   : > { %v2311_v55 = vadd.f32 %v3803_v38, %v2278_v15  ;;  %v2178_v33 = vpop.f32.mrf.mxu0 }
 0x23d   : > { %v2038_v3 = vpop.f32.mrf.mxu3  ;;  %2701 = vmatmul.msk.bf16.gmra.mxu2 %vm693_vm4, %v3629_v30  ;;  %v1753_v40 = vpop.f32.mrf.mxu1  ;;  %v4199_v30 = vld [vmem:[#allocation42_spill] sm:$0xff] }
 0x23e   : > { %v2343_v19 = vmax.f32 %v2311_v55, 0.0  ;;  %v2105_v48 = vadd.f32 %v2038_v3, %v1949_v44  ;;  %v1701_v45 = vrot.slane %v4199_v30, 5  ;;  %v1817_v37 = vadd.f32 %v1753_v40, %v3633_v49 }
 0x23f   : > { %v1978_v3 = vrot.slane %v1976_v25, 5 }
 0x240   : > { %2376 = vst.msk [vmem:[%s3814_s20 + $0x40] sm:$0xff] %vm2367_vm8, %v2343_v19  ;;  %v2245_v6 = vadd.f32 %v2178_v33, %v2105_v48  ;;  %v1885_v18 = vpop.f32.mrf.mxu2  ;;  %v1703_v35 = vrot.slane %v1701_v45, 4  ;;  %v1702_v55 = vsel %vm3214_vm7, %v2665_v60, %v1701_v45  ;;  %v1984_v19 = vrot.slane %v1982_v41, 5 }
 0x241   : > { %v1950_v34 = vadd.f32 %v1885_v18, %v1816_v39  ;;  %v1988_v48 = vrot.slane %v1986_v9, 4 }
 0x242   : > { %v2279_v4 = vmul.f32 %v3799_v27, %v2245_v6  ;;  %2718 = vmatmul.msk.bf16.gmra.mxu3 %vm693_vm4, %v3223_v53  ;;  %v1973_v53 = vshrl.u32 %v3899_v10, 16  ;;  %v254_v6 = vld [vmem:[%s2884_s29 + $0xd4] sm:$0x1] }
 0x243   : > { %v1992_v30 = vshll.u32 %v254_v6, 16 }
 0x244   : > { %v2312_v21 = vadd.f32 %v3803_v38, %v2279_v4  ;;  %v2181_v62 = vpop.f32.mrf.mxu0  ;;  %v1975_v33 = vrot.slane %v1973_v53, 4  ;;  %v1708_v4 = vunpack.c.l.b16 %v1702_v55 }
 0x245   : > { %v2041_v1 = vpop.f32.mrf.mxu3  ;;  %v1756_v12 = vpop.f32.mrf.mxu1  ;;  %v1994_v25 = vrot.slane %v1992_v30, 5 }
 0x246   : > { %v2344_v57 = vmax.f32 %v2312_v21, 0.0  ;;  %v2106_v42 = vadd.f32 %v2041_v1, %v1950_v34  ;;  %v1979_v21 = vor.u32 %v1978_v3, %v1975_v33  ;;  %v1818_v1 = vadd.f32 %v1756_v12, %v3650_v7  ;;  %v2759_v3 = vld [vmem:[%s2884_s29 + $0xcc] sm:$0xff] }
 0x247   : > { %2736 = vmatmul.msk.bf16.gmra.mxu0 %vm693_vm4, %v3652_v46  ;;  %v2134_v33 = vrot.slane %v254_v6, 5 }
 0x248   : > { %2377 = vst.msk [vmem:[%s3814_s20 + $0x48] sm:$0xff] %vm2367_vm8, %v2344_v57  ;;  %v2246_v43 = vadd.f32 %v2181_v62, %v2106_v42  ;;  %v1887_v17 = vpop.f32.mrf.mxu2  ;;  %2681 = vmatmul.msk.bf16.gmra.mxu1 %vm693_vm4, %v3652_v46  ;;  %v1705_v46 = vsel %vm3214_vm7, %v1703_v35, %v1704_v13  ;;  %v1989_v62 = vor.u32 %v1988_v48, %v1984_v19  ;;  %v1980_v60 = vrot.slane %v1979_v21, 4 }
 0x249   : > { %v1951_v44 = vadd.f32 %v1887_v17, %v1817_v37  ;;  %v1709_v34 = vunpack.c.l.b16 %v1705_v46  ;;  %v2721_v13 = vrot.slane %v3899_v10, 9 }
 0x24a   : > { %v2280_v15 = vmul.f32 %v3799_v27, %v2246_v43  ;;  %v1990_v53 = vrot.slane %v1989_v62, 4  ;;  %v2131_v43 = vrot.slane %v3902_v24, 5 }
 0x24b   : > { %v1710_v32 = vpack.c.b16 %v1709_v34, %v1708_v4 }
 0x24c   : > { %v2313_v49 = vadd.f32 %v3803_v38, %v2280_v15  ;;  %v2183_v40 = vpop.f32.mrf.mxu0  ;;  %v1995_v35 = vsel %vm2911_vm3, %v1990_v53, %v1994_v25  ;;  %v2133_v55 = vrot.slane %v2131_v43, 4  ;;  %v2132_v46 = vsel %vm3214_vm7, %v2721_v13, %v2131_v43 }
 0x24d   : > { %v2043_v50 = vpop.f32.mrf.mxu3  ;;  %2702 = vmatmul.msk.bf16.gmra.mxu2 %vm693_vm4, %v3661_v54  ;;  %v1758_v11 = vpop.f32.mrf.mxu1  ;;  %v1999_v36 = vunpack.c.l.b16 %v1995_v35  ;;  %v2138_v4 = vunpack.c.l.b16 %v2132_v46 }
 0x24e   : > { %v2345_v39 = vmax.f32 %v2313_v49, 0.0  ;;  %v2107_v18 = vadd.f32 %v2043_v50, %v1951_v44  ;;  %v1819_v24 = vadd.f32 %v1758_v11, %v3664_v28  ;;  %v2135_v28 = vsel %vm3214_vm7, %v2133_v55, %v2134_v33 }
 0x24f   : > { %v2139_v34 = vunpack.c.l.b16 %v2135_v28 }
 0x250   : > { %2378 = vst.msk [vmem:[%s3814_s20 + $0x50] sm:$0xff] %vm2367_vm8, %v2345_v39  ;;  %v2247_v45 = vadd.f32 %v2183_v40, %v2107_v18  ;;  %v1890_v57 = vpop.f32.mrf.mxu2 }
 0x251   : > { %v1952_v54 = vadd.f32 %v1890_v57, %v1818_v1  ;;  %v2140_v1 = vpack.c.b16 %v2139_v34, %v2138_v4 }
 0x252   : > { %v2281_v42 = vmul.f32 %v3799_v27, %v2247_v45  ;;  %2719 = vmatmul.msk.bf16.gmra.mxu3 %vm693_vm4, %v3668_v22  ;;  %v1985_v22 = vsel %vm2911_vm3, %v1980_v60, %v1984_v19 }
 0x253   : > { %v1998_v49 = vunpack.c.l.b16 %v1985_v22 }
 0x254   : > { %v2314_v41 = vadd.f32 %v3803_v38, %v2281_v42  ;;  %v2186_v9 = vpop.f32.mrf.mxu0 }
 0x255   : > { %v2046_v37 = vpop.f32.mrf.mxu3  ;;  %v1761_v7 = vpop.f32.mrf.mxu1  ;;  %v2000_v18 = vpack.c.b16 %v1999_v36, %v1998_v49 }
 0x256   : > { %v2346_v12 = vmax.f32 %v2314_v41, 0.0  ;;  %v2108_v17 = vadd.f32 %v2046_v37, %v1952_v54  ;;  %v1820_v62 = vadd.f32 %v1761_v7, %v3675_v58 }
 0x257   : > { %2737 = vmatmul.msk.bf16.gmra.mxu0 %vm693_vm4, %v1710_v32 }
 0x258   : > { %2379 = vst.msk [vmem:[%s3814_s20 + $0x58] sm:$0xff] %vm2367_vm8, %v2346_v12  ;;  %v2248_v15 = vadd.f32 %v2186_v9, %v2108_v17  ;;  %v1892_v44 = vpop.f32.mrf.mxu2  ;;  %2682 = vmatmul.msk.bf16.gmra.mxu1 %vm693_vm4, %v1710_v32 }
 0x259   : > { %v1953_v19 = vadd.f32 %v1892_v44, %v1819_v24 }
 0x25a   : > { %v2282_v48 = vmul.f32 %v3799_v27, %v2248_v15 }
 0x25c   : > { %v2315_v40 = vadd.f32 %v3803_v38, %v2282_v48  ;;  %v2188_v10 = vpop.f32.mrf.mxu0 }
 0x25d   : > { %v2048_v50 = vpop.f32.mrf.mxu3  ;;  %2703 = vmatmul.msk.bf16.gmra.mxu2 %vm693_vm4, %v2759_v3  ;;  %v1763_v6 = vpop.f32.mrf.mxu1 }
 0x25e   : > { %v2347_v11 = vmax.f32 %v2315_v40, 0.0  ;;  %v2109_v39 = vadd.f32 %v2048_v50, %v1953_v19  ;;  %v1821_v25 = vadd.f32 %v1763_v6, %v3680_v31 }
 0x260   : > { %2380 = vst.msk [vmem:[%s3814_s20 + $0x60] sm:$0xff] %vm2367_vm8, %v2347_v11  ;;  %v2249_v21 = vadd.f32 %v2188_v10, %v2109_v39  ;;  %v1895_v30 = vpop.f32.mrf.mxu2 }
 0x261   : > { %v1954_v14 = vadd.f32 %v1895_v30, %v1820_v62 }
 0x262   : > { %v2283_v45 = vmul.f32 %v3799_v27, %v2249_v21  ;;  %2720 = vmatmul.msk.bf16.gmra.mxu3 %vm693_vm4, %v2000_v18 }
 0x264   : > { %v2316_v57 = vadd.f32 %v3803_v38, %v2283_v45  ;;  %v2191_v42 = vpop.f32.mrf.mxu0 }
 0x265   : > { %v2051_v54 = vpop.f32.mrf.mxu3  ;;  %v1766_v32 = vpop.f32.mrf.mxu1 }
 0x266   : > { %v2348_v60 = vmax.f32 %v2316_v57, 0.0  ;;  %v2110_v53 = vadd.f32 %v2051_v54, %v1954_v14  ;;  %v1822_v15 = vadd.f32 %v1766_v32, %v3689_v16 }
 0x267   : > { %2738 = vmatmul.msk.bf16.gmra.mxu0 %vm693_vm4, %v2140_v1 }
 0x268   : > { %2381 = vst.msk [vmem:[%s3814_s20 + $0x68] sm:$0xff] %vm2367_vm8, %v2348_v60  ;;  %v2250_v58 = vadd.f32 %v2191_v42, %v2110_v53  ;;  %v1897_v41 = vpop.f32.mrf.mxu2 }
 0x269   : > { %v1955_v43 = vadd.f32 %v1897_v41, %v1821_v25 }
 0x26a   : > { %v2284_v9 = vmul.f32 %v3799_v27, %v2250_v58 }
 0x26c   : > { %v2317_v37 = vadd.f32 %v3803_v38, %v2284_v9  ;;  %v2193_v7 = vpop.f32.mrf.mxu0 }
 0x26d   : > { %v2053_v12 = vpop.f32.mrf.mxu3  ;;  %v1768_v17 = vpop.f32.mrf.mxu1 }
 0x26e   : > { %v2349_v22 = vmax.f32 %v2317_v37, 0.0  ;;  %v2111_v35 = vadd.f32 %v2053_v12, %v1955_v43  ;;  %v1823_v40 = vadd.f32 %v1768_v17, %v3694_v26 }
 0x270   : > { %2382 = vst.msk [vmem:[%s3814_s20 + $0x70] sm:$0xff] %vm2367_vm8, %v2349_v22  ;;  %v2251_v13 = vadd.f32 %v2193_v7, %v2111_v35  ;;  %v1900_v24 = vpop.f32.mrf.mxu2 }
 0x271   : > { %v1956_v44 = vadd.f32 %v1900_v24, %v1822_v15 }
 0x272   : > { %v2285_v31 = vmul.f32 %v3799_v27, %v2251_v13 }
 0x274   : > { %v2318_v55 = vadd.f32 %v3803_v38, %v2285_v31  ;;  %v2196_v33 = vpop.f32.mrf.mxu0 }
 0x275   : > { %v2056_v3 = vpop.f32.mrf.mxu3  ;;  %v1771_v48 = vpop.f32.mrf.mxu1 }
 0x276   : > { %v2350_v19 = vmax.f32 %v2318_v55, 0.0  ;;  %v2112_v49 = vadd.f32 %v2056_v3, %v1956_v44  ;;  %v1824_v34 = vadd.f32 %v1771_v48, %v3703_v59 }
 0x278   : > { %2383 = vst.msk [vmem:[%s3814_s20 + $0x78] sm:$0xff] %vm2367_vm8, %v2350_v19  ;;  %v2252_v36 = vadd.f32 %v2196_v33, %v2112_v49  ;;  %v1902_v10 = vpop.f32.mrf.mxu2 }
 0x279   : > { %v1957_v46 = vadd.f32 %v1902_v10, %v1823_v40 }
 0x27a   : > { %v2286_v16 = vmul.f32 %v3799_v27, %v2252_v36 }
 0x27c   : > { %v2319_v28 = vadd.f32 %v3803_v38, %v2286_v16  ;;  %v2198_v50 = vpop.f32.mrf.mxu0 }
 0x27d   : > { %v2058_v6 = vpop.f32.mrf.mxu3  ;;  %v1773_v11 = vpop.f32.mrf.mxu1 }
 0x27e   : > { %v2351_v39 = vmax.f32 %v2319_v28, 0.0  ;;  %v2113_v18 = vadd.f32 %v2058_v6, %v1957_v46  ;;  %v1825_v32 = vadd.f32 %v1773_v11, %v3708_v47 }
 0x280   : > { %2384 = vst.msk [vmem:[%s3814_s20 + $0x80] sm:$0xff] %vm2367_vm8, %v2351_v39  ;;  %v2253_v4 = vadd.f32 %v2198_v50, %v2113_v18  ;;  %v1905_v21 = vpop.f32.mrf.mxu2 }
 0x281   : > { %v1958_v62 = vadd.f32 %v1905_v21, %v1824_v34 }
 0x282   : > { %v2287_v26 = vmul.f32 %v3799_v27, %v2253_v4 }
 0x284   : > { %v2320_v30 = vadd.f32 %v3803_v38, %v2287_v26  ;;  %v2201_v45 = vpop.f32.mrf.mxu0 }
 0x285   : > { %v2061_v14 = vpop.f32.mrf.mxu3  ;;  %v1776_v1 = vpop.f32.mrf.mxu1 }
 0x286   : > { %v2352_v57 = vmax.f32 %v2320_v30, 0.0  ;;  %v2114_v42 = vadd.f32 %v2061_v14, %v1958_v62  ;;  %v1826_v12 = vadd.f32 %v1776_v1, %v3717_v23 }
 0x288   : > { %2385 = vst.msk [vmem:[%s3814_s20 + $0x88] sm:$0xff] %vm2367_vm8, %v2352_v57  ;;  %v2254_v54 = vadd.f32 %v2201_v45, %v2114_v42  ;;  %v1907_v60 = vpop.f32.mrf.mxu2 }
 0x289   : > { %v1959_v53 = vadd.f32 %v1907_v60, %v1825_v32 }
 0x28a   : > { %v2288_v59 = vmul.f32 %v3799_v27, %v2254_v54 }
 0x28c   : > { %v2321_v58 = vadd.f32 %v3803_v38, %v2288_v59  ;;  %v2203_v25 = vpop.f32.mrf.mxu0 }
 0x28d   : > { %v2063_v41 = vpop.f32.mrf.mxu3  ;;  %v1778_v9 = vpop.f32.mrf.mxu1 }
 0x28e   : > { %v2353_v43 = vmax.f32 %v2321_v58, 0.0  ;;  %v2115_v37 = vadd.f32 %v2063_v41, %v1959_v53  ;;  %v1827_v33 = vadd.f32 %v1778_v9, %v3722_v61 }
 0x290   : > { %2386 = vst.msk [vmem:[%s3814_s20 + $0x90] sm:$0xff] %vm2367_vm8, %v2353_v43  ;;  %v2255_v7 = vadd.f32 %v2203_v25, %v2115_v37  ;;  %v1910_v17 = vpop.f32.mrf.mxu2 }
 0x291   : > { %v1960_v22 = vadd.f32 %v1910_v17, %v1826_v12 }
 0x292   : > { %v2289_v47 = vmul.f32 %v3799_v27, %v2255_v7 }
 0x294   : > { %v2322_v35 = vadd.f32 %v3803_v38, %v2289_v47  ;;  %v2206_v13 = vpop.f32.mrf.mxu0 }
 0x295   : > { %v2066_v15 = vpop.f32.mrf.mxu3  ;;  %v1781_v24 = vpop.f32.mrf.mxu1 }
 0x296   : > { %v2354_v31 = vmax.f32 %v2322_v35, 0.0  ;;  %v2116_v44 = vadd.f32 %v2066_v15, %v1960_v22  ;;  %v1828_v28 = vadd.f32 %v1781_v24, %v3731_v56 }
 0x298   : > { %2387 = vst.msk [vmem:[%s3814_s20 + $0x98] sm:$0xff] %vm2367_vm8, %v2354_v31  ;;  %v2256_v55 = vadd.f32 %v2206_v13, %v2116_v44  ;;  %v1912_v3 = vpop.f32.mrf.mxu2 }
 0x299   : > { %v1961_v48 = vadd.f32 %v1912_v3, %v1827_v33 }
 0x29a   : > { %v2290_v23 = vmul.f32 %v3799_v27, %v2256_v55 }
 0x29c   : > { %v2323_v19 = vadd.f32 %v3803_v38, %v2290_v23  ;;  %v2208_v49 = vpop.f32.mrf.mxu0 }
 0x29d   : > { %v2068_v36 = vpop.f32.mrf.mxu3  ;;  %v1783_v40 = vpop.f32.mrf.mxu1 }
 0x29e   : > { %v2355_v10 = vmax.f32 %v2323_v19, 0.0  ;;  %v2117_v16 = vadd.f32 %v2068_v36, %v1961_v48  ;;  %v1829_v62 = vadd.f32 %v1783_v40, %v3736_v0 }
 0x2a0   : > { %2388 = vst.msk [vmem:[%s3814_s20 + $0xa0] sm:$0xff] %vm2367_vm8, %v2355_v10  ;;  %v2257_v46 = vadd.f32 %v2208_v49, %v2117_v16  ;;  %v1915_v50 = vpop.f32.mrf.mxu2 }
 0x2a1   : > { %v1962_v6 = vadd.f32 %v1915_v50, %v1828_v28 }
 0x2a2   : > { %v2291_v61 = vmul.f32 %v3799_v27, %v2257_v46 }
 0x2a4   : > { %v2324_v11 = vadd.f32 %v3803_v38, %v2291_v61  ;;  %v2211_v39 = vpop.f32.mrf.mxu0 }
 0x2a5   : > { %v2071_v18 = vpop.f32.mrf.mxu3  ;;  %v1786_v4 = vpop.f32.mrf.mxu1 }
 0x2a6   : > { %v2356_v34 = vmax.f32 %v2324_v11, 0.0  ;;  %v2118_v21 = vadd.f32 %v2071_v18, %v1962_v6  ;;  %v1830_v59 = vadd.f32 %v1786_v4, %v3745_v29 }
 0x2a8   : > { %2389 = vst.msk [vmem:[%s3814_s20 + $0xa8] sm:$0xff] %vm2367_vm8, %v2356_v34  ;;  %v2258_v26 = vadd.f32 %v2211_v39, %v2118_v21  ;;  %v1917_v30 = vpop.f32.mrf.mxu2 }
 0x2a9   : > { %v1963_v45 = vadd.f32 %v1917_v30, %v1829_v62 }
 0x2aa   : > { %v2292_v56 = vmul.f32 %v3799_v27, %v2258_v26 }
 0x2ac   : > { %v2325_v14 = vadd.f32 %v3803_v38, %v2292_v56  ;;  %v2213_v1 = vpop.f32.mrf.mxu0 }
 0x2ad   : > { %v2073_v57 = vpop.f32.mrf.mxu3  ;;  %v1788_v42 = vpop.f32.mrf.mxu1 }
 0x2ae   : > { %v2357_v54 = vmax.f32 %v2325_v14, 0.0  ;;  %v2119_v32 = vadd.f32 %v2073_v57, %v1963_v45  ;;  %v1831_v17 = vadd.f32 %v1788_v42, %v3750_v52 }
 0x2b0   : > { %2390 = vst.msk [vmem:[%s3814_s20 + $0xb0] sm:$0xff] %vm2367_vm8, %v2357_v54  ;;  %v2259_v60 = vadd.f32 %v2213_v1, %v2119_v32  ;;  %v1920_v53 = vpop.f32.mrf.mxu2 }
 0x2b1   : > { %v1964_v58 = vadd.f32 %v1920_v53, %v1830_v59 }
 0x2b2   : > { %v2293_v0 = vmul.f32 %v3799_v27, %v2259_v60 }
 0x2b4   : > { %v2326_v25 = vadd.f32 %v3803_v38, %v2293_v0  ;;  %v2216_v41 = vpop.f32.mrf.mxu0 }
 0x2b5   : > { %v2076_v9 = vpop.f32.mrf.mxu3  ;;  %v1791_v43 = vpop.f32.mrf.mxu1 }
 0x2b6   : > { %v2358_v37 = vmax.f32 %v2326_v25, 0.0  ;;  %v2120_v7 = vadd.f32 %v2076_v9, %v1964_v58  ;;  %v1832_v33 = vadd.f32 %v1791_v43, %v3759_v20 }
 0x2b8   : > { %2391 = vst.msk [vmem:[%s3814_s20 + $0xb8] sm:$0xff] %vm2367_vm8, %v2358_v37  ;;  %v2260_v12 = vadd.f32 %v2216_v41, %v2120_v7  ;;  %v1922_v47 = vpop.f32.mrf.mxu2 }
 0x2b9   : > { %v1965_v22 = vadd.f32 %v1922_v47, %v1831_v17 }
 0x2ba   : > { %v2294_v29 = vmul.f32 %v3799_v27, %v2260_v12 }
 0x2bc   : > { %v2327_v35 = vadd.f32 %v3803_v38, %v2294_v29  ;;  %v2218_v13 = vpop.f32.mrf.mxu0 }
 0x2bd   : > { %v2078_v15 = vpop.f32.mrf.mxu3  ;;  %v1793_v24 = vpop.f32.mrf.mxu1 }
 0x2be   : > { %v2359_v31 = vmax.f32 %v2327_v35, 0.0  ;;  %v2121_v44 = vadd.f32 %v2078_v15, %v1965_v22  ;;  %v1833_v46 = vadd.f32 %v1793_v24, %v3764_v8 }
 0x2c0   : > { %2392 = vst.msk [vmem:[%s3814_s20 + $0xc0] sm:$0xff] %vm2367_vm8, %v2359_v31  ;;  %v2261_v55 = vadd.f32 %v2218_v13, %v2121_v44  ;;  %v1925_v3 = vpop.f32.mrf.mxu2 }
 0x2c1   : > { %v1966_v23 = vadd.f32 %v1925_v3, %v1832_v33 }
 0x2c2   : > { %v2295_v52 = vmul.f32 %v3799_v27, %v2261_v55 }
 0x2c4   : > { %v2328_v48 = vadd.f32 %v3803_v38, %v2295_v52  ;;  %v2221_v19 = vpop.f32.mrf.mxu0 }
 0x2c5   : > { %v2081_v49 = vpop.f32.mrf.mxu3  ;;  %v1796_v10 = vpop.f32.mrf.mxu1 }
 0x2c6   : > { %v2360_v36 = vmax.f32 %v2328_v48, 0.0  ;;  %v2122_v40 = vadd.f32 %v2081_v49, %v1966_v23  ;;  %v1834_v34 = vadd.f32 %v1796_v10, %v3773_v51 }
 0x2c8   : > { %2393 = vst.msk [vmem:[%s3814_s20 + $0xc8] sm:$0xff] %vm2367_vm8, %v2360_v36  ;;  %v2262_v16 = vadd.f32 %v2221_v19, %v2122_v40  ;;  %v1927_v28 = vpop.f32.mrf.mxu2 }
 0x2c9   : > { %v1967_v50 = vadd.f32 %v1927_v28, %v1833_v46 }
 0x2ca   : > { %v2296_v20 = vmul.f32 %v3799_v27, %v2262_v16 }
 0x2cc   : > { %v2329_v61 = vadd.f32 %v3803_v38, %v2296_v20  ;;  %v2223_v6 = vpop.f32.mrf.mxu0 }
 0x2cd   : > { %v2083_v11 = vpop.f32.mrf.mxu3  ;;  %v1798_v26 = vpop.f32.mrf.mxu1 }
 0x2ce   : > { %v2361_v39 = vmax.f32 %v2329_v61, 0.0  ;;  %v2123_v18 = vadd.f32 %v2083_v11, %v1967_v50  ;;  %v1835_v42 = vadd.f32 %v1798_v26, %v3778_v63 }
 0x2d0   : > { %2394 = vst.msk [vmem:[%s3814_s20 + $0xd0] sm:$0xff] %vm2367_vm8, %v2361_v39  ;;  %v2263_v4 = vadd.f32 %v2223_v6, %v2123_v18  ;;  %v1930_v21 = vpop.f32.mrf.mxu2 }
 0x2d1   : > { %v1968_v62 = vadd.f32 %v1930_v21, %v1834_v34 }
 0x2d2   : > { %v2297_v8 = vmul.f32 %v3799_v27, %v2263_v4 }
 0x2d4   : > { %v2330_v30 = vadd.f32 %v3803_v38, %v2297_v8  ;;  %v2226_v56 = vpop.f32.mrf.mxu0 }
 0x2d5   : > { %v2086_v45 = vpop.f32.mrf.mxu3  ;;  %v1801_v60 = vpop.f32.mrf.mxu1 }
 0x2d6   : > { %v2362_v14 = vmax.f32 %v2330_v30, 0.0  ;;  %v2124_v1 = vadd.f32 %v2086_v45, %v1968_v62  ;;  %v1836_v9 = vadd.f32 %v1801_v60, %v3787_v2 }
 0x2d8   : > { %2395 = vst.msk [vmem:[%s3814_s20 + $0xd8] sm:$0xff] %vm2367_vm8, %v2362_v14  ;;  %v2264_v57 = vadd.f32 %v2226_v56, %v2124_v1  ;;  %v1932_v54 = vpop.f32.mrf.mxu2 }
 0x2d9   : > { %v1969_v32 = vadd.f32 %v1932_v54, %v1835_v42 }
 0x2da   : > { %v2298_v51 = vmul.f32 %v3799_v27, %v2264_v57 }
 0x2dc   : > { %v2331_v59 = vadd.f32 %v3803_v38, %v2298_v51  ;;  %v2228_v53 = vpop.f32.mrf.mxu0 }
 0x2dd   : > { %v2088_v0 = vpop.f32.mrf.mxu3  ;;  %v1803_v12 = vpop.f32.mrf.mxu1 }
 0x2de   : > { %v2363_v58 = vmax.f32 %v2331_v59, 0.0  ;;  %v2125_v25 = vadd.f32 %v2088_v0, %v1969_v32  ;;  %v1837_v13 = vadd.f32 %v1803_v12, %v3792_v5 }
 0x2e0   : > { %2396 = vst.msk [vmem:[%s3814_s20 + $0xe0] sm:$0xff] %vm2367_vm8, %v2363_v58  ;;  %v2265_v41 = vadd.f32 %v2228_v53, %v2125_v25  ;;  %v1935_v43 = vpop.f32.mrf.mxu2 }
 0x2e1   : > { %v1970_v37 = vadd.f32 %v1935_v43, %v1836_v9 }
 0x2e2   : > { %v2299_v63 = vmul.f32 %v3799_v27, %v2265_v41 }
 0x2e4   : > { %v2332_v7 = vadd.f32 %v3803_v38, %v2299_v63  ;;  %v2231_v17 = vpop.f32.mrf.mxu0 }
 0x2e5   : > { %v2091_v47 = vpop.f32.mrf.mxu3 }
 0x2e6   : > { %v2364_v29 = vmax.f32 %v2332_v7, 0.0  ;;  %v2126_v22 = vadd.f32 %v2091_v47, %v1970_v37 }
 0x2e8   : > { %2397 = vst.msk [vmem:[%s3814_s20 + $0xe8] sm:$0xff] %vm2367_vm8, %v2364_v29  ;;  %v2266_v35 = vadd.f32 %v2231_v17, %v2126_v22  ;;  %v1937_v15 = vpop.f32.mrf.mxu2 }
 0x2e9   : > { %v1971_v24 = vadd.f32 %v1937_v15, %v1837_v13 }
 0x2ea   : > { %v2300_v2 = vmul.f32 %v3799_v27, %v2266_v35 }
 0x2ec   : > { %v2333_v31 = vadd.f32 %v3803_v38, %v2300_v2  ;;  %v2233_v3 = vpop.f32.mrf.mxu0 }
 0x2ed   : > { %v2093_v44 = vpop.f32.mrf.mxu3 }
 0x2ee   : > { %v2365_v55 = vmax.f32 %v2333_v31, 0.0  ;;  %v2127_v33 = vadd.f32 %v2093_v44, %v1971_v24 }
 0x2f0   : > { %2398 = vst.msk [vmem:[%s3814_s20 + $0xf0] sm:$0xff] %vm2367_vm8, %v2365_v55  ;;  %v2267_v52 = vadd.f32 %v2233_v3, %v2127_v33 }
 0x2f2   : > { %v2301_v23 = vmul.f32 %v3799_v27, %v2267_v52 }
 0x2f4   : > { %v2334_v48 = vadd.f32 %v3803_v38, %v2301_v23 }
 0x2f6   : > { %v2366_v19 = vmax.f32 %v2334_v48, 0.0 }
 0x2f8   : > { %2399 = vst.msk [vmem:[%s3814_s20 + $0xf8] sm:$0xff] %vm2367_vm8, %v2366_v19 }
 0x2f9 PF: > { %s13_s14 = sadd.s32 1, %s2818_s14   ;;  %s4201_s12 = smov %s2814_s13 }
 0x2fa   : > { %p10_p5 = scmp.ge.s32.totalorder %s13_s14, 4   ;;  %s4202_s13 = smov %s4204_s15 }
 0x2fc   :  { %12 = sbr.rel (!%p10_p5) target bundleno = 2 (0x2), region = 71 }

</bundles_post_ra>
